<compile_context>
chip_gen: v7x
topology: tpu7x:2x2x1
jax: 0.10.0
libtpu: 0.0.40
codegen_flags: <defaults>
</compile_context>

<pallas_src>
import math
import functools

import jax
import jax.numpy as jnp
from jax import lax
from jax.experimental import pallas as pl
from jax.experimental.pallas import tpu as pltpu


CHUNK = 8  # scan time-step chunk = one sublane tile


# ---------------------------------------------------------------------------
# Fused Block kernel: add + LayerNorm + Mamba (S6) mixer, one batch element
# per grid step.
# ---------------------------------------------------------------------------
def _block_kernel(*refs, has_residual, eps, Lp, d_inner, d_state, d_conv):
    idx = 0
    h_ref = refs[idx]; idx += 1
    r_ref = None
    if has_residual:
        r_ref = refs[idx]; idx += 1
    (lnw_ref, lnb_ref, win_ref, cw_ref, cb_ref, wx_ref, wdt_ref, bdt_ref,
     nega_ref, dpar_ref, wout_ref,
     o_ref, res_ref,
     xc_scr, dt_scr, zg_scr, bc_scr, y_scr) = refs[idx:]

    bf16 = jnp.bfloat16
    f32 = jnp.float32

    # ---- fused residual add + LayerNorm (prenorm), all f32 ----------------
    h_in = h_ref[0]                                              # (Lp, D)
    res = (h_in + r_ref[0]) if has_residual else h_in
    res_ref[0] = res                                             # residual_in_fp32
    mean = jnp.mean(res, axis=-1, keepdims=True)
    var = jnp.mean((res - mean) ** 2, axis=-1, keepdims=True)
    xn = (res - mean) * lax.rsqrt(var + eps)
    xn = xn * lnw_ref[...] + lnb_ref[...]                        # (Lp, D)

    # ---- fused in_proj: one (D, 2*d_inner) matmul (bf16 MXU, f32 accum) ----
    xz = jnp.dot(xn.astype(bf16), win_ref[...], preferred_element_type=f32)
    xp = xz[:, :d_inner]                                         # (Lp, d_inner)
    z = xz[:, d_inner:]
    zg_scr[...] = z * jax.nn.sigmoid(z)                          # SiLU gate (epilogue)

    # ---- depthwise causal conv1d along L (+ bias, SiLU), f32 ---------------
    cw = cw_ref[...]                                             # (d_conv, d_inner)
    xpad = jnp.concatenate(
        [jnp.zeros((d_conv - 1, d_inner), f32), xp], axis=0)
    conv = cb_ref[...]
    for k in range(d_conv):
        conv = conv + xpad[k:k + Lp, :] * cw[k:k + 1, :]
    x_c = conv * jax.nn.sigmoid(conv)                            # (Lp, d_inner)
    xc_scr[...] = x_c

    # ---- fused x_proj (B | C | dt columns in one matmul) -------------------
    xdbc = jnp.dot(x_c.astype(bf16), wx_ref[...], preferred_element_type=f32)
    bc_scr[...] = xdbc[:, :2 * d_state]                          # (Lp, 2*d_state)
    # dt_proj weight is zero-padded over the B|C columns, so the full fused
    # result can be used directly (no unaligned column slice needed).
    dt = jnp.dot(xdbc.astype(bf16), wdt_ref[...],
                 preferred_element_type=f32) + bdt_ref[...]      # (Lp, d_inner)
    # numerically-stable softplus (no masked inf / wasted exp)
    dt = jnp.maximum(dt, 0.0) + jnp.log(1.0 + jnp.exp(-jnp.abs(dt)))
    dt_scr[...] = dt

    # ---- selective scan: state h = (d_state, d_inner), d_inner on lanes -----
    neg_a = nega_ref[...]                                        # -exp(A_log)^T
    two_s = 2 * d_state
    ri = lax.broadcasted_iota(jnp.int32, (two_s, two_s), 0)
    ci = lax.broadcasted_iota(jnp.int32, (two_s, two_s), 1)
    eye2s = (ri == ci).astype(f32)                               # identity for NT transpose
    row_ids = lax.broadcasted_iota(jnp.int32, (CHUNK, 1), 0)
    n_chunks = Lp // CHUNK

    def chunk_body(c, h):
        base = pl.multiple_of(c * CHUNK, CHUNK)
        dt_c = dt_scr[pl.ds(base, CHUNK), :]                     # (8, d_inner)
        bu_c = dt_c * xc_scr[pl.ds(base, CHUNK), :]              # dt * u
        bc_c = bc_scr[pl.ds(base, CHUNK), :]                     # (8, 2*d_state)
        # one lane->sublane relayout per chunk: bc_c^T via identity NT-matmul
        bcT = lax.dot_general(eye2s, bc_c, (((1,), (1,)), ((), ())),
                              preferred_element_type=f32)        # (2*d_state, 8)
        y_chunk = jnp.zeros((CHUNK, d_inner), f32)
        for j in range(CHUNK):                                   # static unroll
            dt_t = dt_c[j:j + 1, :]                              # (1, d_inner)
            bu_t = bu_c[j:j + 1, :]
            b_col = bcT[:d_state, j:j + 1]                       # (d_state, 1)
            c_col = bcT[d_state:, j:j + 1]
            dA = jnp.exp(neg_a * dt_t)                           # (d_state, d_inner)
            h = dA * h + b_col * bu_t
            y_t = jnp.sum(h * c_col, axis=0, keepdims=True)      # (1, d_inner)
            y_chunk = jnp.where(row_ids == j, y_t, y_chunk)
        y_scr[pl.ds(base, CHUNK), :] = y_chunk                   # one (8, d_inner) store
        return h

    lax.fori_loop(0, n_chunks, chunk_body,
                  jnp.zeros((d_state, d_inner), f32))

    # ---- skip (hoisted), SiLU gate, out_proj --------------------------------
    y = y_scr[...] + xc_scr[...] * dpar_ref[...]                 # (Lp, d_inner)
    y = y * zg_scr[...]
    o_ref[0] = jnp.dot(y.astype(bf16), wout_ref[...],
                       preferred_element_type=f32)               # (Lp, D)


def _block_pallas(hidden, residual, p, eps=1e-5):
    B, L, D = hidden.shape
    d_inner, d_state = p["d_inner"], p["d_state"]
    dt_rank, d_conv = p["dt_rank"], p["d_conv"]
    has_residual = residual is not None

    # pad the sequence to a multiple of the scan chunk (causal ops -> harmless)
    Lp = ((L + CHUNK - 1) // CHUNK) * CHUNK
    if Lp != L:
        pad = ((0, 0), (0, Lp - L), (0, 0))
        hidden = jnp.pad(hidden, pad)
        if has_residual:
            residual = jnp.pad(residual, pad)

    neg_A_T = -jnp.exp(p["A_log_T"])     # hoisted out of the kernel

    kernel = functools.partial(
        _block_kernel, has_residual=has_residual, eps=eps, Lp=Lp,
        d_inner=d_inner, d_state=d_state, d_conv=d_conv)

    seq_spec = pl.BlockSpec((1, Lp, D), lambda b: (b, 0, 0))

    def w2(shape):
        return pl.BlockSpec(shape, lambda b: (0, 0))

    in_specs = [seq_spec]
    inputs = [hidden]
    if has_residual:
        in_specs.append(seq_spec)
        inputs.append(residual)
    W = 2 * d_state + dt_rank
    in_specs += [
        w2((1, D)), w2((1, D)),                       # LN weight / bias
        w2((D, 2 * d_inner)),                         # fused in_proj (x | z)
        w2((d_conv, d_inner)), w2((1, d_inner)),      # conv weight / bias
        w2((d_inner, W)),                             # fused x_proj (B | C | dt)
        w2((W, d_inner)), w2((1, d_inner)),           # dt_proj (zero-padded K) / bias
        w2((d_state, d_inner)),                       # -exp(A_log)^T
        w2((1, d_inner)),                             # D skip
        w2((d_inner, D)),                             # out_proj
    ]
    inputs += [p["ln_w"], p["ln_b"], p["w_in"], p["conv_w"], p["conv_b"],
               p["w_x"], p["w_dt"], p["dt_b"], neg_A_T, p["D_skip"], p["w_out"]]

    scratch = [
        pltpu.VMEM((Lp, d_inner), jnp.float32),       # x_c (conv+SiLU)
        pltpu.VMEM((Lp, d_inner), jnp.float32),       # dt (softplus)
        pltpu.VMEM((Lp, d_inner), jnp.float32),       # z gate
        pltpu.VMEM((Lp, 2 * d_state), jnp.float32),   # B | C
        pltpu.VMEM((Lp, d_inner), jnp.float32),       # scan output y
    ]

    out, res = pl.pallas_call(
        kernel,
        out_shape=(jax.ShapeDtypeStruct((B, Lp, D), jnp.float32),
                   jax.ShapeDtypeStruct((B, Lp, D), jnp.float32)),
        grid=(B,),
        in_specs=in_specs,
        out_specs=(seq_spec, seq_spec),
        scratch_shapes=scratch,
        compiler_params=pltpu.CompilerParams(
            dimension_semantics=("parallel",),
            vmem_limit_bytes=64 * 1024 * 1024),
    )(*inputs)

    if Lp != L:
        out = out[:, :L]
        res = res[:, :L]
    return out, res


# ---------------------------------------------------------------------------
# Block forward:  Add -> LN -> Mixer, returns (hidden_states, residual)
# ---------------------------------------------------------------------------
def block_forward(params, hidden_states, residual=None):
    return _block_pallas(hidden_states, residual, params)


# ---------------------------------------------------------------------------
# Deterministic parameter init (shapes follow Mamba(dim=D, d_state=16,
# d_conv=4, expand=2)); projection weights stored fused / pre-arranged.
# ---------------------------------------------------------------------------
def init_params(key, D, d_state=16, d_conv=4, expand=2):
    d_inner = expand * D
    dt_rank = math.ceil(D / 16)
    ks = jax.random.split(key, 5)
    bf16 = jnp.bfloat16

    def nrm(k, shape, scale=0.1, dtype=jnp.float32):
        return (scale * jax.random.normal(k, shape)).astype(dtype)

    # A_log stored pre-transposed as (d_state, d_inner)
    A_log_T = jnp.log(jnp.tile(
        jnp.arange(1, d_state + 1, dtype=jnp.float32)[:, None], (1, d_inner)))
    # dt_proj weight zero-padded over the B|C columns of the fused x_proj output
    w_dt_core = nrm(ks[3], (dt_rank, d_inner), 0.1)
    w_dt = jnp.concatenate(
        [jnp.zeros((2 * d_state, d_inner), jnp.float32), w_dt_core],
        axis=0).astype(bf16)
    return dict(
        d_inner=d_inner, d_state=d_state, dt_rank=dt_rank, d_conv=d_conv,
        ln_w=jnp.ones((1, D), jnp.float32),
        ln_b=jnp.zeros((1, D), jnp.float32),
        w_in=nrm(ks[0], (D, 2 * d_inner), dtype=bf16),          # [x | z]
        conv_w=nrm(ks[1], (d_conv, d_inner), 0.2),
        conv_b=jnp.zeros((1, d_inner), jnp.float32),
        w_x=nrm(ks[2], (d_inner, 2 * d_state + dt_rank), dtype=bf16),  # [B | C | dt]
        w_dt=w_dt,
        dt_b=jnp.full((1, d_inner), math.log(math.expm1(0.01)), jnp.float32),
        A_log_T=A_log_T,
        D_skip=jnp.ones((1, d_inner), jnp.float32),
        w_out=nrm(ks[4], (d_inner, D), dtype=bf16),
    )


# ---------------------------------------------------------------------------
# Pure-JAX reference (mirrors the kernel's bf16-matmul / f32-elsewhere recipe)
# ---------------------------------------------------------------------------
def reference_block(p, hidden, residual=None, eps=1e-5):
    res = hidden if residual is None else residual + hidden
    mean = res.mean(-1, keepdims=True)
    var = ((res - mean) ** 2).mean(-1, keepdims=True)
    xn = (res - mean) * lax.rsqrt(var + eps)
    xn = xn * p["ln_w"] + p["ln_b"]

    d_inner, d_state = p["d_inner"], p["d_state"]
    d_conv = p["d_conv"]
    L = hidden.shape[1]
    bf16 = jnp.bfloat16

    def mixer_one(xb):
        xz = jnp.dot(xb.astype(bf16), p["w_in"], preferred_element_type=jnp.float32)
        xp, z = xz[:, :d_inner], xz[:, d_inner:]
        xpad = jnp.concatenate(
            [jnp.zeros((d_conv - 1, d_inner), jnp.float32), xp], axis=0)
        conv = p["conv_b"]
        for k in range(d_conv):
            conv = conv + xpad[k:k + L] * p["conv_w"][k:k + 1]
        x_c = conv * jax.nn.sigmoid(conv)

        xdbc = jnp.dot(x_c.astype(bf16), p["w_x"], preferred_element_type=jnp.float32)
        Bm = xdbc[:, :d_state]
        Cm = xdbc[:, d_state:2 * d_state]
        dt = jnp.dot(xdbc.astype(bf16), p["w_dt"],
                     preferred_element_type=jnp.float32) + p["dt_b"]
        dt = jnp.maximum(dt, 0.0) + jnp.log(1.0 + jnp.exp(-jnp.abs(dt)))

        A_T = -jnp.exp(p["A_log_T"])                 # (d_state, d_inner)
        bu = dt * x_c

        def step(h, inp):
            dt_t, bu_t, b_t, c_t = inp
            dA = jnp.exp(A_T * dt_t[None, :])
            h = dA * h + b_t[:, None] * bu_t[None, :]
            y = jnp.sum(h * c_t[:, None], axis=0)
            return h, y

        h0 = jnp.zeros((d_state, d_inner), jnp.float32)
        _, ys = lax.scan(step, h0, (dt, bu, Bm, Cm))
        y = ys + x_c * p["D_skip"]
        y = y * (z * jax.nn.sigmoid(z))
        return jnp.dot(y.astype(bf16), p["w_out"], preferred_element_type=jnp.float32)

    return jax.vmap(mixer_one)(xn), res


if __name__ == "__main__":
    # D chosen so d_inner = 2*D = 128 sits exactly on one lane tile.
    B, L, D = 2, 8, 64
    key = jax.random.PRNGKey(0)
    kp, kh = jax.random.split(key, 2)
    params = init_params(kp, D)
    hidden = jax.random.normal(kh, (B, L, D), jnp.float32)

    # first block (residual=None), then a chained second block (residual given)
    h1, r1 = block_forward(params, hidden, None)
    h2, r2 = block_forward(params, h1, r1)
    jax.block_until_ready((h2, r2))

    rh1, rr1 = reference_block(params, hidden, None)
    rh2, rr2 = reference_block(params, rh1, rr1)
    for got, want in ((h1, rh1), (r1, rr1), (h2, rh2), (r2, rr2)):
        err = float(jnp.max(jnp.abs(got - want)))
        assert jnp.allclose(got, want, rtol=2e-2, atol=2e-3), err

    print("KERNEL_OK")
</pallas_src>

<mosaic_0001>
module attributes {stable_mosaic.version = 11 : i64} {
  func.func @_block_kernel(%arg0: i32, %arg1: memref<1x8x64xf32, #tpu.memory_space<vmem>>, %arg2: memref<1x64xf32, #tpu.memory_space<vmem>>, %arg3: memref<1x64xf32, #tpu.memory_space<vmem>>, %arg4: memref<64x256xbf16, #tpu.memory_space<vmem>>, %arg5: memref<4x128xf32, #tpu.memory_space<vmem>>, %arg6: memref<1x128xf32, #tpu.memory_space<vmem>>, %arg7: memref<128x36xbf16, #tpu.memory_space<vmem>>, %arg8: memref<36x128xbf16, #tpu.memory_space<vmem>>, %arg9: memref<1x128xf32, #tpu.memory_space<vmem>>, %arg10: memref<16x128xf32, #tpu.memory_space<vmem>>, %arg11: memref<1x128xf32, #tpu.memory_space<vmem>>, %arg12: memref<128x64xbf16, #tpu.memory_space<vmem>>, %arg13: memref<1x8x64xf32, #tpu.memory_space<vmem>>, %arg14: memref<1x8x64xf32, #tpu.memory_space<vmem>>, %arg15: memref<8x128xf32, #tpu.memory_space<vmem>>, %arg16: memref<8x128xf32, #tpu.memory_space<vmem>>, %arg17: memref<8x128xf32, #tpu.memory_space<vmem>>, %arg18: memref<8x32xf32, #tpu.memory_space<vmem>>, %arg19: memref<8x128xf32, #tpu.memory_space<vmem>>) attributes {dimension_semantics = [#tpu.dimension_semantics<parallel>], iteration_bounds = array<i64: 2>, scalar_prefetch = 0 : i64, scratch_operands = 5 : i64, tpu.core_type = #tpu.core_type<tc>, window_params = [{transform_indices = @transform_0, window_bounds = array<i64: 1, 8, 64>}, {pipeline_mode = #tpu.pipeline_mode<synchronous>, transform_indices = @transform_1, window_bounds = array<i64: 1, 64>}, {pipeline_mode = #tpu.pipeline_mode<synchronous>, transform_indices = @transform_2, window_bounds = array<i64: 1, 64>}, {pipeline_mode = #tpu.pipeline_mode<synchronous>, transform_indices = @transform_3, window_bounds = array<i64: 64, 256>}, {pipeline_mode = #tpu.pipeline_mode<synchronous>, transform_indices = @transform_4, window_bounds = array<i64: 4, 128>}, {pipeline_mode = #tpu.pipeline_mode<synchronous>, transform_indices = @transform_5, window_bounds = array<i64: 1, 128>}, {pipeline_mode = #tpu.pipeline_mode<synchronous>, transform_indices = @transform_6, window_bounds = array<i64: 128, 36>}, {pipeline_mode = #tpu.pipeline_mode<synchronous>, transform_indices = @transform_7, window_bounds = array<i64: 36, 128>}, {pipeline_mode = #tpu.pipeline_mode<synchronous>, transform_indices = @transform_8, window_bounds = array<i64: 1, 128>}, {pipeline_mode = #tpu.pipeline_mode<synchronous>, transform_indices = @transform_9, window_bounds = array<i64: 16, 128>}, {pipeline_mode = #tpu.pipeline_mode<synchronous>, transform_indices = @transform_10, window_bounds = array<i64: 1, 128>}, {pipeline_mode = #tpu.pipeline_mode<synchronous>, transform_indices = @transform_11, window_bounds = array<i64: 128, 64>}, {transform_indices = @transform_12, window_bounds = array<i64: 1, 8, 64>}, {transform_indices = @transform_13, window_bounds = array<i64: 1, 8, 64>}]} {
    %c0 = arith.constant 0 : index
    %c0_0 = arith.constant 0 : index
    %c0_1 = arith.constant 0 : index
    %0 = vector.load %arg1[%c0, %c0_0, %c0_1] : memref<1x8x64xf32, #tpu.memory_space<vmem>>, vector<1x8x64xf32>
    %1 = vector.shape_cast %0 : vector<1x8x64xf32> to vector<8x64xf32>
    %c0_2 = arith.constant 0 : index
    %c0_3 = arith.constant 0 : index
    %c0_4 = arith.constant 0 : index
    %2 = vector.load %arg14[%c0_2, %c0_3, %c0_4] : memref<1x8x64xf32, #tpu.memory_space<vmem>>, vector<1x8x64xf32>
    %3 = vector.shape_cast %2 : vector<1x8x64xf32> to vector<8x64xf32>
    %4 = vector.shape_cast %1 : vector<8x64xf32> to vector<1x8x64xf32>
    tpu.vector_store %arg14[%c0_2, %c0_3, %c0_4], %4 {strides = array<i32>} : memref<1x8x64xf32, #tpu.memory_space<vmem>>, vector<1x8x64xf32>,
    %cst = arith.constant dense<0.000000e+00> : vector<8xf32>
    %5 = vector.multi_reduction <add>, %1, %cst [1] : vector<8x64xf32> to vector<8xf32>
    %6 = vector.shape_cast %5 : vector<8xf32> to vector<8x1xf32>
    %cst_5 = arith.constant 6.400000e+01 : f32
    %7 = vector.broadcast %cst_5 : f32 to vector<8x1xf32>
    %8 = arith.divf %6, %7 : vector<8x1xf32>
    %9 = vector.broadcast %8 : vector<8x1xf32> to vector<8x64xf32>
    %10 = arith.subf %1, %9 : vector<8x64xf32>
    %11 = arith.mulf %10, %10 : vector<8x64xf32>
    %cst_6 = arith.constant dense<0.000000e+00> : vector<8xf32>
    %12 = vector.multi_reduction <add>, %11, %cst_6 [1] : vector<8x64xf32> to vector<8xf32>
    %13 = vector.shape_cast %12 : vector<8xf32> to vector<8x1xf32>
    %cst_7 = arith.constant 6.400000e+01 : f32
    %14 = vector.broadcast %cst_7 : f32 to vector<8x1xf32>
    %15 = arith.divf %13, %14 : vector<8x1xf32>
    %16 = vector.broadcast %8 : vector<8x1xf32> to vector<8x64xf32>
    %17 = arith.subf %1, %16 : vector<8x64xf32>
    %cst_8 = arith.constant 9.99999974E-6 : f32
    %18 = vector.broadcast %cst_8 : f32 to vector<8x1xf32>
    %19 = arith.addf %15, %18 : vector<8x1xf32>
    %20 = math.rsqrt %19 : vector<8x1xf32>
    %21 = vector.broadcast %20 : vector<8x1xf32> to vector<8x64xf32>
    %22 = arith.mulf %17, %21 : vector<8x64xf32>
    %c0_9 = arith.constant 0 : index
    %c0_10 = arith.constant 0 : index
    %23 = vector.load %arg2[%c0_9, %c0_10] : memref<1x64xf32, #tpu.memory_space<vmem>>, vector<1x64xf32>
    %24 = vector.broadcast %23 : vector<1x64xf32> to vector<8x64xf32>
    %25 = arith.mulf %22, %24 : vector<8x64xf32>
    %c0_11 = arith.constant 0 : index
    %c0_12 = arith.constant 0 : index
    %26 = vector.load %arg3[%c0_11, %c0_12] : memref<1x64xf32, #tpu.memory_space<vmem>>, vector<1x64xf32>
    %27 = vector.broadcast %26 : vector<1x64xf32> to vector<8x64xf32>
    %28 = arith.addf %25, %27 : vector<8x64xf32>
    %29 = arith.truncf %28 : vector<8x64xf32> to vector<8x64xbf16>
    %c0_13 = arith.constant 0 : index
    %c0_14 = arith.constant 0 : index
    %30 = vector.load %arg4[%c0_13, %c0_14] : memref<64x256xbf16, #tpu.memory_space<vmem>>, vector<64x256xbf16>
    %cst_15 = arith.constant dense<0.000000e+00> : vector<8x256xf32>
    %31 = tpu.matmul %29, %30, %cst_15 {dimension_numbers = #tpu.dot_dimension_numbers<[1], [0], [0], [1], [0, 0, 1, 1], [], []>} : vector<8x64xbf16>, vector<64x256xbf16>, vector<8x256xf32> -> vector<8x256xf32>
    %32 = vector.extract_strided_slice %31 {offsets = [0, 0], sizes = [8, 128], strides = [1, 1]} : vector<8x256xf32> to vector<8x128xf32>
    %33 = vector.extract_strided_slice %31 {offsets = [0, 128], sizes = [8, 128], strides = [1, 1]} : vector<8x256xf32> to vector<8x128xf32>
    %34 = arith.negf %33 : vector<8x128xf32>
    %35 = math.exp %34 : vector<8x128xf32>
    %cst_16 = arith.constant 1.000000e+00 : f32
    %36 = vector.broadcast %cst_16 : f32 to vector<8x128xf32>
    %37 = arith.addf %36, %35 : vector<8x128xf32>
    %38 = arith.divf %36, %37 : vector<8x128xf32>
    %39 = arith.mulf %33, %38 : vector<8x128xf32>
    %c0_17 = arith.constant 0 : index
    %c0_18 = arith.constant 0 : index
    %40 = vector.load %arg17[%c0_17, %c0_18] : memref<8x128xf32, #tpu.memory_space<vmem>>, vector<8x128xf32>
    tpu.vector_store %arg17[%c0_17, %c0_18], %39 {strides = array<i32>} : memref<8x128xf32, #tpu.memory_space<vmem>>, vector<8x128xf32>,
    %c0_19 = arith.constant 0 : index
    %c0_20 = arith.constant 0 : index
    %41 = vector.load %arg5[%c0_19, %c0_20] : memref<4x128xf32, #tpu.memory_space<vmem>>, vector<4x128xf32>
    %cst_21 = arith.constant 0.000000e+00 : f32
    %42 = vector.broadcast %cst_21 : f32 to vector<3x128xf32>
    %43 = tpu.concatenate %42, %32 in 0 : vector<3x128xf32>, vector<8x128xf32> -> vector<11x128xf32>
    %c0_22 = arith.constant 0 : index
    %c0_23 = arith.constant 0 : index
    %44 = vector.load %arg6[%c0_22, %c0_23] : memref<1x128xf32, #tpu.memory_space<vmem>>, vector<1x128xf32>
    %45 = vector.extract_strided_slice %43 {offsets = [0, 0], sizes = [8, 128], strides = [1, 1]} : vector<11x128xf32> to vector<8x128xf32>
    %46 = vector.extract_strided_slice %41 {offsets = [0, 0], sizes = [1, 128], strides = [1, 1]} : vector<4x128xf32> to vector<1x128xf32>
    %47 = vector.broadcast %46 : vector<1x128xf32> to vector<8x128xf32>
    %48 = arith.mulf %45, %47 : vector<8x128xf32>
    %49 = vector.broadcast %44 : vector<1x128xf32> to vector<8x128xf32>
    %50 = arith.addf %49, %48 : vector<8x128xf32>
    %51 = vector.extract_strided_slice %43 {offsets = [1, 0], sizes = [8, 128], strides = [1, 1]} : vector<11x128xf32> to vector<8x128xf32>
    %52 = vector.extract_strided_slice %41 {offsets = [1, 0], sizes = [1, 128], strides = [1, 1]} : vector<4x128xf32> to vector<1x128xf32>
    %53 = vector.broadcast %52 : vector<1x128xf32> to vector<8x128xf32>
    %54 = arith.mulf %51, %53 : vector<8x128xf32>
    %55 = arith.addf %50, %54 : vector<8x128xf32>
    %56 = vector.extract_strided_slice %43 {offsets = [2, 0], sizes = [8, 128], strides = [1, 1]} : vector<11x128xf32> to vector<8x128xf32>
    %57 = vector.extract_strided_slice %41 {offsets = [2, 0], sizes = [1, 128], strides = [1, 1]} : vector<4x128xf32> to vector<1x128xf32>
    %58 = vector.broadcast %57 : vector<1x128xf32> to vector<8x128xf32>
    %59 = arith.mulf %56, %58 : vector<8x128xf32>
    %60 = arith.addf %55, %59 : vector<8x128xf32>
    %61 = vector.extract_strided_slice %43 {offsets = [3, 0], sizes = [8, 128], strides = [1, 1]} : vector<11x128xf32> to vector<8x128xf32>
    %62 = vector.extract_strided_slice %41 {offsets = [3, 0], sizes = [1, 128], strides = [1, 1]} : vector<4x128xf32> to vector<1x128xf32>
    %63 = vector.broadcast %62 : vector<1x128xf32> to vector<8x128xf32>
    %64 = arith.mulf %61, %63 : vector<8x128xf32>
    %65 = arith.addf %60, %64 : vector<8x128xf32>
    %66 = arith.negf %65 : vector<8x128xf32>
    %67 = math.exp %66 : vector<8x128xf32>
    %cst_24 = arith.constant 1.000000e+00 : f32
    %68 = vector.broadcast %cst_24 : f32 to vector<8x128xf32>
    %69 = arith.addf %68, %67 : vector<8x128xf32>
    %70 = arith.divf %68, %69 : vector<8x128xf32>
    %71 = arith.mulf %65, %70 : vector<8x128xf32>
    %c0_25 = arith.constant 0 : index
    %c0_26 = arith.constant 0 : index
    %72 = vector.load %arg15[%c0_25, %c0_26] : memref<8x128xf32, #tpu.memory_space<vmem>>, vector<8x128xf32>
    tpu.vector_store %arg15[%c0_25, %c0_26], %71 {strides = array<i32>} : memref<8x128xf32, #tpu.memory_space<vmem>>, vector<8x128xf32>,
    %73 = arith.truncf %71 : vector<8x128xf32> to vector<8x128xbf16>
    %c0_27 = arith.constant 0 : index
    %c0_28 = arith.constant 0 : index
    %74 = vector.load %arg7[%c0_27, %c0_28] : memref<128x36xbf16, #tpu.memory_space<vmem>>, vector<128x36xbf16>
    %cst_29 = arith.constant dense<0.000000e+00> : vector<8x36xf32>
    %75 = tpu.matmul %73, %74, %cst_29 {dimension_numbers = #tpu.dot_dimension_numbers<[1], [0], [0], [1], [0, 0, 1, 1], [], []>} : vector<8x128xbf16>, vector<128x36xbf16>, vector<8x36xf32> -> vector<8x36xf32>
    %76 = vector.extract_strided_slice %75 {offsets = [0, 0], sizes = [8, 32], strides = [1, 1]} : vector<8x36xf32> to vector<8x32xf32>
    %c0_30 = arith.constant 0 : index
    %c0_31 = arith.constant 0 : index
    %77 = vector.load %arg18[%c0_30, %c0_31] : memref<8x32xf32, #tpu.memory_space<vmem>>, vector<8x32xf32>
    tpu.vector_store %arg18[%c0_30, %c0_31], %76 {strides = array<i32>} : memref<8x32xf32, #tpu.memory_space<vmem>>, vector<8x32xf32>,
    %78 = arith.truncf %75 : vector<8x36xf32> to vector<8x36xbf16>
    %c0_32 = arith.constant 0 : index
    %c0_33 = arith.constant 0 : index
    %79 = vector.load %arg8[%c0_32, %c0_33] : memref<36x128xbf16, #tpu.memory_space<vmem>>, vector<36x128xbf16>
    %cst_34 = arith.constant dense<0.000000e+00> : vector<8x128xf32>
    %80 = tpu.matmul %78, %79, %cst_34 {dimension_numbers = #tpu.dot_dimension_numbers<[1], [0], [0], [1], [0, 0, 1, 1], [], []>} : vector<8x36xbf16>, vector<36x128xbf16>, vector<8x128xf32> -> vector<8x128xf32>
    %c0_35 = arith.constant 0 : index
    %c0_36 = arith.constant 0 : index
    %81 = vector.load %arg9[%c0_35, %c0_36] : memref<1x128xf32, #tpu.memory_space<vmem>>, vector<1x128xf32>
    %82 = vector.broadcast %81 : vector<1x128xf32> to vector<8x128xf32>
    %83 = arith.addf %80, %82 : vector<8x128xf32>
    %cst_37 = arith.constant 0.000000e+00 : f32
    %84 = vector.broadcast %cst_37 : f32 to vector<8x128xf32>
    %85 = arith.maximumf %83, %84 : vector<8x128xf32>
    %86 = math.absf %83 : vector<8x128xf32>
    %cst_38 = arith.constant 0.000000e+00 : f32
    %87 = vector.broadcast %cst_38 : f32 to vector<8x128xf32>
    %88 = arith.subf %87, %86 : vector<8x128xf32>
    %89 = math.exp %88 : vector<8x128xf32>
    %cst_39 = arith.constant 1.000000e+00 : f32
    %90 = vector.broadcast %cst_39 : f32 to vector<8x128xf32>
    %91 = arith.addf %90, %89 : vector<8x128xf32>
    %92 = math.log %91 : vector<8x128xf32>
    %93 = arith.addf %85, %92 : vector<8x128xf32>
    %c0_40 = arith.constant 0 : index
    %c0_41 = arith.constant 0 : index
    %94 = vector.load %arg16[%c0_40, %c0_41] : memref<8x128xf32, #tpu.memory_space<vmem>>, vector<8x128xf32>
    tpu.vector_store %arg16[%c0_40, %c0_41], %93 {strides = array<i32>} : memref<8x128xf32, #tpu.memory_space<vmem>>, vector<8x128xf32>,
    %c0_42 = arith.constant 0 : index
    %c0_43 = arith.constant 0 : index
    %95 = vector.load %arg10[%c0_42, %c0_43] : memref<16x128xf32, #tpu.memory_space<vmem>>, vector<16x128xf32>
    %96 = tpu.iota {dimensions = array<i32: 0>} : vector<32x32xi32>
    %97 = tpu.iota {dimensions = array<i32: 1>} : vector<32x32xi32>
    %98 = arith.cmpi eq, %96, %97 : vector<32x32xi32>
    %99 = arith.extui %98 : vector<32x32xi1> to vector<32x32xi32>
    %100 = arith.sitofp %99 : vector<32x32xi32> to vector<32x32xf32>
    %101 = tpu.iota {dimensions = array<i32: 0>} : vector<8x1xi32>
    %cst_44 = arith.constant 0.000000e+00 : f32
    %102 = vector.broadcast %cst_44 : f32 to vector<16x128xf32>
    %c0_i32 = arith.constant 0 : i32
    %c8_i32 = arith.constant 8 : i32
    %103 = arith.muli %c0_i32, %c8_i32 : i32
    %104 = tpu.assume_multiple %103, 8 : i32
    %105 = arith.index_cast %104 : i32 to index
    %c0_45 = arith.constant 0 : index
    %106 = vector.load %arg16[%105, %c0_45] : memref<8x128xf32, #tpu.memory_space<vmem>>, vector<8x128xf32>
    %107 = arith.index_cast %104 : i32 to index
    %c0_46 = arith.constant 0 : index
    %108 = vector.load %arg15[%107, %c0_46] : memref<8x128xf32, #tpu.memory_space<vmem>>, vector<8x128xf32>
    %109 = arith.mulf %106, %108 : vector<8x128xf32>
    %110 = arith.index_cast %104 : i32 to index
    %c0_47 = arith.constant 0 : index
    %111 = vector.load %arg18[%110, %c0_47] : memref<8x32xf32, #tpu.memory_space<vmem>>, vector<8x32xf32>
    %cst_48 = arith.constant dense<0.000000e+00> : vector<32x8xf32>
    %112 = tpu.matmul %100, %111, %cst_48 {dimension_numbers = #tpu.dot_dimension_numbers<[1], [1], [0], [0], [0, 0, 1, 0], [], []>} : vector<32x32xf32>, vector<8x32xf32>, vector<32x8xf32> -> vector<32x8xf32>
    %cst_49 = arith.constant 0.000000e+00 : f32
    %113 = vector.broadcast %cst_49 : f32 to vector<8x128xf32>
    %114 = vector.extract_strided_slice %106 {offsets = [0, 0], sizes = [1, 128], strides = [1, 1]} : vector<8x128xf32> to vector<1x128xf32>
    %115 = vector.extract_strided_slice %109 {offsets = [0, 0], sizes = [1, 128], strides = [1, 1]} : vector<8x128xf32> to vector<1x128xf32>
    %116 = vector.extract_strided_slice %112 {offsets = [0, 0], sizes = [16, 1], strides = [1, 1]} : vector<32x8xf32> to vector<16x1xf32>
    %117 = vector.extract_strided_slice %112 {offsets = [16, 0], sizes = [16, 1], strides = [1, 1]} : vector<32x8xf32> to vector<16x1xf32>
    %118 = vector.broadcast %114 : vector<1x128xf32> to vector<16x128xf32>
    %119 = arith.mulf %95, %118 : vector<16x128xf32>
    %120 = math.exp %119 : vector<16x128xf32>
    %121 = arith.mulf %120, %102 : vector<16x128xf32>
    %122 = vector.broadcast %116 : vector<16x1xf32> to vector<16x128xf32>
    %123 = vector.broadcast %115 : vector<1x128xf32> to vector<16x128xf32>
    %124 = arith.mulf %122, %123 : vector<16x128xf32>
    %125 = arith.addf %121, %124 : vector<16x128xf32>
    %126 = vector.broadcast %117 : vector<16x1xf32> to vector<16x128xf32>
    %127 = arith.mulf %125, %126 : vector<16x128xf32>
    %cst_50 = arith.constant dense<0.000000e+00> : vector<128xf32>
    %128 = vector.multi_reduction <add>, %127, %cst_50 [0] : vector<16x128xf32> to vector<128xf32>
    %129 = vector.shape_cast %128 : vector<128xf32> to vector<1x128xf32>
    %c0_i32_51 = arith.constant 0 : i32
    %130 = vector.broadcast %c0_i32_51 : i32 to vector<8x1xi32>
    %131 = arith.cmpi eq, %101, %130 : vector<8x1xi32>
    %132 = vector.shape_cast %131 : vector<8x1xi1> to vector<8x1xi1>
    %133 = vector.broadcast %132 : vector<8x1xi1> to vector<8x128xi1>
    %134 = vector.shape_cast %129 : vector<1x128xf32> to vector<1x128xf32>
    %135 = vector.broadcast %134 : vector<1x128xf32> to vector<8x128xf32>
    %136 = arith.select %133, %135, %113 : vector<8x128xi1>, vector<8x128xf32>
    %137 = vector.extract_strided_slice %106 {offsets = [1, 0], sizes = [1, 128], strides = [1, 1]} : vector<8x128xf32> to vector<1x128xf32>
    %138 = vector.extract_strided_slice %109 {offsets = [1, 0], sizes = [1, 128], strides = [1, 1]} : vector<8x128xf32> to vector<1x128xf32>
    %139 = vector.extract_strided_slice %112 {offsets = [0, 1], sizes = [16, 1], strides = [1, 1]} : vector<32x8xf32> to vector<16x1xf32>
    %140 = vector.extract_strided_slice %112 {offsets = [16, 1], sizes = [16, 1], strides = [1, 1]} : vector<32x8xf32> to vector<16x1xf32>
    %141 = vector.broadcast %137 : vector<1x128xf32> to vector<16x128xf32>
    %142 = arith.mulf %95, %141 : vector<16x128xf32>
    %143 = math.exp %142 : vector<16x128xf32>
    %144 = arith.mulf %143, %125 : vector<16x128xf32>
    %145 = vector.broadcast %139 : vector<16x1xf32> to vector<16x128xf32>
    %146 = vector.broadcast %138 : vector<1x128xf32> to vector<16x128xf32>
    %147 = arith.mulf %145, %146 : vector<16x128xf32>
    %148 = arith.addf %144, %147 : vector<16x128xf32>
    %149 = vector.broadcast %140 : vector<16x1xf32> to vector<16x128xf32>
    %150 = arith.mulf %148, %149 : vector<16x128xf32>
    %cst_52 = arith.constant dense<0.000000e+00> : vector<128xf32>
    %151 = vector.multi_reduction <add>, %150, %cst_52 [0] : vector<16x128xf32> to vector<128xf32>
    %152 = vector.shape_cast %151 : vector<128xf32> to vector<1x128xf32>
    %c1_i32 = arith.constant 1 : i32
    %153 = vector.broadcast %c1_i32 : i32 to vector<8x1xi32>
    %154 = arith.cmpi eq, %101, %153 : vector<8x1xi32>
    %155 = vector.shape_cast %154 : vector<8x1xi1> to vector<8x1xi1>
    %156 = vector.broadcast %155 : vector<8x1xi1> to vector<8x128xi1>
    %157 = vector.shape_cast %152 : vector<1x128xf32> to vector<1x128xf32>
    %158 = vector.broadcast %157 : vector<1x128xf32> to vector<8x128xf32>
    %159 = arith.select %156, %158, %136 : vector<8x128xi1>, vector<8x128xf32>
    %160 = vector.extract_strided_slice %106 {offsets = [2, 0], sizes = [1, 128], strides = [1, 1]} : vector<8x128xf32> to vector<1x128xf32>
    %161 = vector.extract_strided_slice %109 {offsets = [2, 0], sizes = [1, 128], strides = [1, 1]} : vector<8x128xf32> to vector<1x128xf32>
    %162 = vector.extract_strided_slice %112 {offsets = [0, 2], sizes = [16, 1], strides = [1, 1]} : vector<32x8xf32> to vector<16x1xf32>
    %163 = vector.extract_strided_slice %112 {offsets = [16, 2], sizes = [16, 1], strides = [1, 1]} : vector<32x8xf32> to vector<16x1xf32>
    %164 = vector.broadcast %160 : vector<1x128xf32> to vector<16x128xf32>
    %165 = arith.mulf %95, %164 : vector<16x128xf32>
    %166 = math.exp %165 : vector<16x128xf32>
    %167 = arith.mulf %166, %148 : vector<16x128xf32>
    %168 = vector.broadcast %162 : vector<16x1xf32> to vector<16x128xf32>
    %169 = vector.broadcast %161 : vector<1x128xf32> to vector<16x128xf32>
    %170 = arith.mulf %168, %169 : vector<16x128xf32>
    %171 = arith.addf %167, %170 : vector<16x128xf32>
    %172 = vector.broadcast %163 : vector<16x1xf32> to vector<16x128xf32>
    %173 = arith.mulf %171, %172 : vector<16x128xf32>
    %cst_53 = arith.constant dense<0.000000e+00> : vector<128xf32>
    %174 = vector.multi_reduction <add>, %173, %cst_53 [0] : vector<16x128xf32> to vector<128xf32>
    %175 = vector.shape_cast %174 : vector<128xf32> to vector<1x128xf32>
    %c2_i32 = arith.constant 2 : i32
    %176 = vector.broadcast %c2_i32 : i32 to vector<8x1xi32>
    %177 = arith.cmpi eq, %101, %176 : vector<8x1xi32>
    %178 = vector.shape_cast %177 : vector<8x1xi1> to vector<8x1xi1>
    %179 = vector.broadcast %178 : vector<8x1xi1> to vector<8x128xi1>
    %180 = vector.shape_cast %175 : vector<1x128xf32> to vector<1x128xf32>
    %181 = vector.broadcast %180 : vector<1x128xf32> to vector<8x128xf32>
    %182 = arith.select %179, %181, %159 : vector<8x128xi1>, vector<8x128xf32>
    %183 = vector.extract_strided_slice %106 {offsets = [3, 0], sizes = [1, 128], strides = [1, 1]} : vector<8x128xf32> to vector<1x128xf32>
    %184 = vector.extract_strided_slice %109 {offsets = [3, 0], sizes = [1, 128], strides = [1, 1]} : vector<8x128xf32> to vector<1x128xf32>
    %185 = vector.extract_strided_slice %112 {offsets = [0, 3], sizes = [16, 1], strides = [1, 1]} : vector<32x8xf32> to vector<16x1xf32>
    %186 = vector.extract_strided_slice %112 {offsets = [16, 3], sizes = [16, 1], strides = [1, 1]} : vector<32x8xf32> to vector<16x1xf32>
    %187 = vector.broadcast %183 : vector<1x128xf32> to vector<16x128xf32>
    %188 = arith.mulf %95, %187 : vector<16x128xf32>
    %189 = math.exp %188 : vector<16x128xf32>
    %190 = arith.mulf %189, %171 : vector<16x128xf32>
    %191 = vector.broadcast %185 : vector<16x1xf32> to vector<16x128xf32>
    %192 = vector.broadcast %184 : vector<1x128xf32> to vector<16x128xf32>
    %193 = arith.mulf %191, %192 : vector<16x128xf32>
    %194 = arith.addf %190, %193 : vector<16x128xf32>
    %195 = vector.broadcast %186 : vector<16x1xf32> to vector<16x128xf32>
    %196 = arith.mulf %194, %195 : vector<16x128xf32>
    %cst_54 = arith.constant dense<0.000000e+00> : vector<128xf32>
    %197 = vector.multi_reduction <add>, %196, %cst_54 [0] : vector<16x128xf32> to vector<128xf32>
    %198 = vector.shape_cast %197 : vector<128xf32> to vector<1x128xf32>
    %c3_i32 = arith.constant 3 : i32
    %199 = vector.broadcast %c3_i32 : i32 to vector<8x1xi32>
    %200 = arith.cmpi eq, %101, %199 : vector<8x1xi32>
    %201 = vector.shape_cast %200 : vector<8x1xi1> to vector<8x1xi1>
    %202 = vector.broadcast %201 : vector<8x1xi1> to vector<8x128xi1>
    %203 = vector.shape_cast %198 : vector<1x128xf32> to vector<1x128xf32>
    %204 = vector.broadcast %203 : vector<1x128xf32> to vector<8x128xf32>
    %205 = arith.select %202, %204, %182 : vector<8x128xi1>, vector<8x128xf32>
    %206 = vector.extract_strided_slice %106 {offsets = [4, 0], sizes = [1, 128], strides = [1, 1]} : vector<8x128xf32> to vector<1x128xf32>
    %207 = vector.extract_strided_slice %109 {offsets = [4, 0], sizes = [1, 128], strides = [1, 1]} : vector<8x128xf32> to vector<1x128xf32>
    %208 = vector.extract_strided_slice %112 {offsets = [0, 4], sizes = [16, 1], strides = [1, 1]} : vector<32x8xf32> to vector<16x1xf32>
    %209 = vector.extract_strided_slice %112 {offsets = [16, 4], sizes = [16, 1], strides = [1, 1]} : vector<32x8xf32> to vector<16x1xf32>
    %210 = vector.broadcast %206 : vector<1x128xf32> to vector<16x128xf32>
    %211 = arith.mulf %95, %210 : vector<16x128xf32>
    %212 = math.exp %211 : vector<16x128xf32>
    %213 = arith.mulf %212, %194 : vector<16x128xf32>
    %214 = vector.broadcast %208 : vector<16x1xf32> to vector<16x128xf32>
    %215 = vector.broadcast %207 : vector<1x128xf32> to vector<16x128xf32>
    %216 = arith.mulf %214, %215 : vector<16x128xf32>
    %217 = arith.addf %213, %216 : vector<16x128xf32>
    %218 = vector.broadcast %209 : vector<16x1xf32> to vector<16x128xf32>
    %219 = arith.mulf %217, %218 : vector<16x128xf32>
    %cst_55 = arith.constant dense<0.000000e+00> : vector<128xf32>
    %220 = vector.multi_reduction <add>, %219, %cst_55 [0] : vector<16x128xf32> to vector<128xf32>
    %221 = vector.shape_cast %220 : vector<128xf32> to vector<1x128xf32>
    %c4_i32 = arith.constant 4 : i32
    %222 = vector.broadcast %c4_i32 : i32 to vector<8x1xi32>
    %223 = arith.cmpi eq, %101, %222 : vector<8x1xi32>
    %224 = vector.shape_cast %223 : vector<8x1xi1> to vector<8x1xi1>
    %225 = vector.broadcast %224 : vector<8x1xi1> to vector<8x128xi1>
    %226 = vector.shape_cast %221 : vector<1x128xf32> to vector<1x128xf32>
    %227 = vector.broadcast %226 : vector<1x128xf32> to vector<8x128xf32>
    %228 = arith.select %225, %227, %205 : vector<8x128xi1>, vector<8x128xf32>
    %229 = vector.extract_strided_slice %106 {offsets = [5, 0], sizes = [1, 128], strides = [1, 1]} : vector<8x128xf32> to vector<1x128xf32>
    %230 = vector.extract_strided_slice %109 {offsets = [5, 0], sizes = [1, 128], strides = [1, 1]} : vector<8x128xf32> to vector<1x128xf32>
    %231 = vector.extract_strided_slice %112 {offsets = [0, 5], sizes = [16, 1], strides = [1, 1]} : vector<32x8xf32> to vector<16x1xf32>
    %232 = vector.extract_strided_slice %112 {offsets = [16, 5], sizes = [16, 1], strides = [1, 1]} : vector<32x8xf32> to vector<16x1xf32>
    %233 = vector.broadcast %229 : vector<1x128xf32> to vector<16x128xf32>
    %234 = arith.mulf %95, %233 : vector<16x128xf32>
    %235 = math.exp %234 : vector<16x128xf32>
    %236 = arith.mulf %235, %217 : vector<16x128xf32>
    %237 = vector.broadcast %231 : vector<16x1xf32> to vector<16x128xf32>
    %238 = vector.broadcast %230 : vector<1x128xf32> to vector<16x128xf32>
    %239 = arith.mulf %237, %238 : vector<16x128xf32>
    %240 = arith.addf %236, %239 : vector<16x128xf32>
    %241 = vector.broadcast %232 : vector<16x1xf32> to vector<16x128xf32>
    %242 = arith.mulf %240, %241 : vector<16x128xf32>
    %cst_56 = arith.constant dense<0.000000e+00> : vector<128xf32>
    %243 = vector.multi_reduction <add>, %242, %cst_56 [0] : vector<16x128xf32> to vector<128xf32>
    %244 = vector.shape_cast %243 : vector<128xf32> to vector<1x128xf32>
    %c5_i32 = arith.constant 5 : i32
    %245 = vector.broadcast %c5_i32 : i32 to vector<8x1xi32>
    %246 = arith.cmpi eq, %101, %245 : vector<8x1xi32>
    %247 = vector.shape_cast %246 : vector<8x1xi1> to vector<8x1xi1>
    %248 = vector.broadcast %247 : vector<8x1xi1> to vector<8x128xi1>
    %249 = vector.shape_cast %244 : vector<1x128xf32> to vector<1x128xf32>
    %250 = vector.broadcast %249 : vector<1x128xf32> to vector<8x128xf32>
    %251 = arith.select %248, %250, %228 : vector<8x128xi1>, vector<8x128xf32>
    %252 = vector.extract_strided_slice %106 {offsets = [6, 0], sizes = [1, 128], strides = [1, 1]} : vector<8x128xf32> to vector<1x128xf32>
    %253 = vector.extract_strided_slice %109 {offsets = [6, 0], sizes = [1, 128], strides = [1, 1]} : vector<8x128xf32> to vector<1x128xf32>
    %254 = vector.extract_strided_slice %112 {offsets = [0, 6], sizes = [16, 1], strides = [1, 1]} : vector<32x8xf32> to vector<16x1xf32>
    %255 = vector.extract_strided_slice %112 {offsets = [16, 6], sizes = [16, 1], strides = [1, 1]} : vector<32x8xf32> to vector<16x1xf32>
    %256 = vector.broadcast %252 : vector<1x128xf32> to vector<16x128xf32>
    %257 = arith.mulf %95, %256 : vector<16x128xf32>
    %258 = math.exp %257 : vector<16x128xf32>
    %259 = arith.mulf %258, %240 : vector<16x128xf32>
    %260 = vector.broadcast %254 : vector<16x1xf32> to vector<16x128xf32>
    %261 = vector.broadcast %253 : vector<1x128xf32> to vector<16x128xf32>
    %262 = arith.mulf %260, %261 : vector<16x128xf32>
    %263 = arith.addf %259, %262 : vector<16x128xf32>
    %264 = vector.broadcast %255 : vector<16x1xf32> to vector<16x128xf32>
    %265 = arith.mulf %263, %264 : vector<16x128xf32>
    %cst_57 = arith.constant dense<0.000000e+00> : vector<128xf32>
    %266 = vector.multi_reduction <add>, %265, %cst_57 [0] : vector<16x128xf32> to vector<128xf32>
    %267 = vector.shape_cast %266 : vector<128xf32> to vector<1x128xf32>
    %c6_i32 = arith.constant 6 : i32
    %268 = vector.broadcast %c6_i32 : i32 to vector<8x1xi32>
    %269 = arith.cmpi eq, %101, %268 : vector<8x1xi32>
    %270 = vector.shape_cast %269 : vector<8x1xi1> to vector<8x1xi1>
    %271 = vector.broadcast %270 : vector<8x1xi1> to vector<8x128xi1>
    %272 = vector.shape_cast %267 : vector<1x128xf32> to vector<1x128xf32>
    %273 = vector.broadcast %272 : vector<1x128xf32> to vector<8x128xf32>
    %274 = arith.select %271, %273, %251 : vector<8x128xi1>, vector<8x128xf32>
    %275 = vector.extract_strided_slice %106 {offsets = [7, 0], sizes = [1, 128], strides = [1, 1]} : vector<8x128xf32> to vector<1x128xf32>
    %276 = vector.extract_strided_slice %109 {offsets = [7, 0], sizes = [1, 128], strides = [1, 1]} : vector<8x128xf32> to vector<1x128xf32>
    %277 = vector.extract_strided_slice %112 {offsets = [0, 7], sizes = [16, 1], strides = [1, 1]} : vector<32x8xf32> to vector<16x1xf32>
    %278 = vector.extract_strided_slice %112 {offsets = [16, 7], sizes = [16, 1], strides = [1, 1]} : vector<32x8xf32> to vector<16x1xf32>
    %279 = vector.broadcast %275 : vector<1x128xf32> to vector<16x128xf32>
    %280 = arith.mulf %95, %279 : vector<16x128xf32>
    %281 = math.exp %280 : vector<16x128xf32>
    %282 = arith.mulf %281, %263 : vector<16x128xf32>
    %283 = vector.broadcast %277 : vector<16x1xf32> to vector<16x128xf32>
    %284 = vector.broadcast %276 : vector<1x128xf32> to vector<16x128xf32>
    %285 = arith.mulf %283, %284 : vector<16x128xf32>
    %286 = arith.addf %282, %285 : vector<16x128xf32>
    %287 = vector.broadcast %278 : vector<16x1xf32> to vector<16x128xf32>
    %288 = arith.mulf %286, %287 : vector<16x128xf32>
    %cst_58 = arith.constant dense<0.000000e+00> : vector<128xf32>
    %289 = vector.multi_reduction <add>, %288, %cst_58 [0] : vector<16x128xf32> to vector<128xf32>
    %290 = vector.shape_cast %289 : vector<128xf32> to vector<1x128xf32>
    %c7_i32 = arith.constant 7 : i32
    %291 = vector.broadcast %c7_i32 : i32 to vector<8x1xi32>
    %292 = arith.cmpi eq, %101, %291 : vector<8x1xi32>
    %293 = vector.shape_cast %292 : vector<8x1xi1> to vector<8x1xi1>
    %294 = vector.broadcast %293 : vector<8x1xi1> to vector<8x128xi1>
    %295 = vector.shape_cast %290 : vector<1x128xf32> to vector<1x128xf32>
    %296 = vector.broadcast %295 : vector<1x128xf32> to vector<8x128xf32>
    %297 = arith.select %294, %296, %274 : vector<8x128xi1>, vector<8x128xf32>
    %298 = arith.index_cast %104 : i32 to index
    %c0_59 = arith.constant 0 : index
    %299 = vector.load %arg19[%298, %c0_59] : memref<8x128xf32, #tpu.memory_space<vmem>>, vector<8x128xf32>
    tpu.vector_store %arg19[%298, %c0_59], %297 {strides = array<i32>} : memref<8x128xf32, #tpu.memory_space<vmem>>, vector<8x128xf32>,
    %c1_i32_60 = arith.constant 1 : i32
    %c0_61 = arith.constant 0 : index
    %c0_62 = arith.constant 0 : index
    %300 = vector.load %arg19[%c0_61, %c0_62] : memref<8x128xf32, #tpu.memory_space<vmem>>, vector<8x128xf32>
    %c0_63 = arith.constant 0 : index
    %c0_64 = arith.constant 0 : index
    %301 = vector.load %arg15[%c0_63, %c0_64] : memref<8x128xf32, #tpu.memory_space<vmem>>, vector<8x128xf32>
    %c0_65 = arith.constant 0 : index
    %c0_66 = arith.constant 0 : index
    %302 = vector.load %arg11[%c0_65, %c0_66] : memref<1x128xf32, #tpu.memory_space<vmem>>, vector<1x128xf32>
    %303 = vector.broadcast %302 : vector<1x128xf32> to vector<8x128xf32>
    %304 = arith.mulf %301, %303 : vector<8x128xf32>
    %305 = arith.addf %300, %304 : vector<8x128xf32>
    %c0_67 = arith.constant 0 : index
    %c0_68 = arith.constant 0 : index
    %306 = vector.load %arg17[%c0_67, %c0_68] : memref<8x128xf32, #tpu.memory_space<vmem>>, vector<8x128xf32>
    %307 = arith.mulf %305, %306 : vector<8x128xf32>
    %308 = arith.truncf %307 : vector<8x128xf32> to vector<8x128xbf16>
    %c0_69 = arith.constant 0 : index
    %c0_70 = arith.constant 0 : index
    %309 = vector.load %arg12[%c0_69, %c0_70] : memref<128x64xbf16, #tpu.memory_space<vmem>>, vector<128x64xbf16>
    %cst_71 = arith.constant dense<0.000000e+00> : vector<8x64xf32>
    %310 = tpu.matmul %308, %309, %cst_71 {dimension_numbers = #tpu.dot_dimension_numbers<[1], [0], [0], [1], [0, 0, 1, 1], [], []>} : vector<8x128xbf16>, vector<128x64xbf16>, vector<8x64xf32> -> vector<8x64xf32>
    %c0_72 = arith.constant 0 : index
    %c0_73 = arith.constant 0 : index
    %c0_74 = arith.constant 0 : index
    %311 = vector.load %arg13[%c0_72, %c0_73, %c0_74] : memref<1x8x64xf32, #tpu.memory_space<vmem>>, vector<1x8x64xf32>
    %312 = vector.shape_cast %311 : vector<1x8x64xf32> to vector<8x64xf32>
    %313 = vector.shape_cast %310 : vector<8x64xf32> to vector<1x8x64xf32>
    tpu.vector_store %arg13[%c0_72, %c0_73, %c0_74], %313 {strides = array<i32>} : memref<1x8x64xf32, #tpu.memory_space<vmem>>, vector<1x8x64xf32>,
    return
  }
  func.func @transform_0(%arg0: i32) -> (i32, i32, i32) {
    %c0_i32 = arith.constant 0 : i32
    %c0_i32_0 = arith.constant 0 : i32
    %c0_i32_1 = arith.constant 0 : i32
    return %arg0, %c0_i32, %c0_i32_0 : i32, i32, i32
  }
  func.func @transform_1(%arg0: i32) -> (i32, i32) {
    %c0_i32 = arith.constant 0 : i32
    %c0_i32_0 = arith.constant 0 : i32
    %c0_i32_1 = arith.constant 0 : i32
    return %c0_i32, %c0_i32_0 : i32, i32
  }
  func.func @transform_2(%arg0: i32) -> (i32, i32) {
    %c0_i32 = arith.constant 0 : i32
    %c0_i32_0 = arith.constant 0 : i32
    %c0_i32_1 = arith.constant 0 : i32
    return %c0_i32, %c0_i32_0 : i32, i32
  }
  func.func @transform_3(%arg0: i32) -> (i32, i32) {
    %c0_i32 = arith.constant 0 : i32
    %c0_i32_0 = arith.constant 0 : i32
    %c0_i32_1 = arith.constant 0 : i32
    return %c0_i32, %c0_i32_0 : i32, i32
  }
  func.func @transform_4(%arg0: i32) -> (i32, i32) {
    %c0_i32 = arith.constant 0 : i32
    %c0_i32_0 = arith.constant 0 : i32
    %c0_i32_1 = arith.constant 0 : i32
    return %c0_i32, %c0_i32_0 : i32, i32
  }
  func.func @transform_5(%arg0: i32) -> (i32, i32) {
    %c0_i32 = arith.constant 0 : i32
    %c0_i32_0 = arith.constant 0 : i32
    %c0_i32_1 = arith.constant 0 : i32
    return %c0_i32, %c0_i32_0 : i32, i32
  }
  func.func @transform_6(%arg0: i32) -> (i32, i32) {
    %c0_i32 = arith.constant 0 : i32
    %c0_i32_0 = arith.constant 0 : i32
    %c0_i32_1 = arith.constant 0 : i32
    return %c0_i32, %c0_i32_0 : i32, i32
  }
  func.func @transform_7(%arg0: i32) -> (i32, i32) {
    %c0_i32 = arith.constant 0 : i32
    %c0_i32_0 = arith.constant 0 : i32
    %c0_i32_1 = arith.constant 0 : i32
    return %c0_i32, %c0_i32_0 : i32, i32
  }
  func.func @transform_8(%arg0: i32) -> (i32, i32) {
    %c0_i32 = arith.constant 0 : i32
    %c0_i32_0 = arith.constant 0 : i32
    %c0_i32_1 = arith.constant 0 : i32
    return %c0_i32, %c0_i32_0 : i32, i32
  }
  func.func @transform_9(%arg0: i32) -> (i32, i32) {
    %c0_i32 = arith.constant 0 : i32
    %c0_i32_0 = arith.constant 0 : i32
    %c0_i32_1 = arith.constant 0 : i32
    return %c0_i32, %c0_i32_0 : i32, i32
  }
  func.func @transform_10(%arg0: i32) -> (i32, i32) {
    %c0_i32 = arith.constant 0 : i32
    %c0_i32_0 = arith.constant 0 : i32
    %c0_i32_1 = arith.constant 0 : i32
    return %c0_i32, %c0_i32_0 : i32, i32
  }
  func.func @transform_11(%arg0: i32) -> (i32, i32) {
    %c0_i32 = arith.constant 0 : i32
    %c0_i32_0 = arith.constant 0 : i32
    %c0_i32_1 = arith.constant 0 : i32
    return %c0_i32, %c0_i32_0 : i32, i32
  }
  func.func @transform_12(%arg0: i32) -> (i32, i32, i32) {
    %c0_i32 = arith.constant 0 : i32
    %c0_i32_0 = arith.constant 0 : i32
    %c0_i32_1 = arith.constant 0 : i32
    return %arg0, %c0_i32, %c0_i32_0 : i32, i32, i32
  }
  func.func @transform_13(%arg0: i32) -> (i32, i32, i32) {
    %c0_i32 = arith.constant 0 : i32
    %c0_i32_0 = arith.constant 0 : i32
    %c0_i32_1 = arith.constant 0 : i32
    return %arg0, %c0_i32, %c0_i32_0 : i32, i32, i32
  }
}

</mosaic_0001>

<bundles_post_ra>
// kernel: tpu_custom_call.1
= control target key start
LH: loop header
LB: loop body
LE: loop exit
PB: predicated region body
PF: predicated region fallthrough
CT: control target
= control target key end

     0   :  { %s3656_s0 = inlined_call_operand.hbm [shape: f32[2,8,64], index: 0, kind: input, shape index: {}]   ;;  %s3657_s1 = inlined_call_operand.hbm [shape: f32[1,64], index: 1, kind: input, shape index: {}]   ;;  %s3658_s2 = inlined_call_operand.hbm [shape: f32[1,64], index: 2, kind: input, shape index: {}]   ;;  %s3659_s3 = inlined_call_operand.hbm [shape: bf16[64,256], index: 3, kind: input, shape index: {}]   ;;  %s3660_s4 = inlined_call_operand.hbm [shape: f32[4,128], index: 4, kind: input, shape index: {}]   ;;  %s3661_s5 = inlined_call_operand.hbm [shape: f32[1,128], index: 5, kind: input, shape index: {}]   ;;  %s3662_s6 = inlined_call_operand.hbm [shape: bf16[128,36], index: 6, kind: input, shape index: {}]   ;;  %s3663_s7 = inlined_call_operand.hbm [shape: bf16[36,128], index: 7, kind: input, shape index: {}]   ;;  %s3664_s8 = inlined_call_operand.hbm [shape: f32[1,128], index: 8, kind: input, shape index: {}]   ;;  %s3665_s9 = inlined_call_operand.hbm [shape: f32[16,128], index: 9, kind: input, shape index: {}]   ;;  %s3666_s10 = inlined_call_operand.hbm [shape: f32[1,128], index: 10, kind: input, shape index: {}]   ;;  %s3667_s11 = inlined_call_operand.hbm [shape: bf16[128,64], index: 11, kind: input, shape index: {}]   ;;  %s3668_s12 = inlined_call_operand.hbm [shape: f32[2,8,64], index: 12, kind: output, shape index: {0}]   ;;  %s3669_s13 = inlined_call_operand.hbm [shape: f32[2,8,64], index: 13, kind: output, shape index: {1}]  }
   0x1   :  { %3683 = sst [smem:[#allocation40_spill]] %s3656_s0 }
   0x2   :  { %3684 = sst [smem:[#allocation41_spill]] %s3657_s1 }
   0x3   :  { %3685 = sst [smem:[#allocation42_spill]] %s3659_s3 }
   0x4   :  { %3686 = sst [smem:[#allocation43_spill]] %s3661_s5 }
   0x5   :  { %3687 = sst [smem:[#allocation44_spill]] %s3668_s12 }
   0x6   :  { %3688 = sst [smem:[#allocation45_spill]] %s3669_s13 }
   0x7   :  { %19 = vsyncpa [#allocation8], 0 }
   0x8   :  { %21 = vsyncpa [#allocation8 + $0x1], 0 }
   0x9   :  { %22 = vsyncpa [#allocation11], 0 }
   0xa   :  { %23 = vsyncpa [#allocation14], 0 }
   0xb   :  { %24 = vsyncpa [#allocation17], 0 }
   0xc   :  { %25 = vsyncpa [#allocation20], 0 }
   0xd   :  { %26 = vsyncpa [#allocation23], 0 }
   0xe   :  { %27 = vsyncpa [#allocation26], 0 }
   0xf   :  { %28 = vsyncpa [#allocation9], 0 }
  0x10   :  { %30 = vsyncpa [#allocation9 + $0x1], 0 }
  0x11   :  { %31 = vsyncpa [#allocation29], 0 }
  0x12   :  { %33 = vsyncpa [#allocation29 + $0x1], 0  ;;  %s2903_s25 = smov 0   ;;  %s2905_s26 = smov 0  }
  0x13   :  { %s2907_s27 = smov 0   ;;  %s2909_s28 = smov 0  }
  0x14 LB: > { %s2805_s29 = smov [#allocation10]   ;;  %s2924_s14 = sadd.s32 4294967295, %s2803_s28   ;;  %s2803_s28 = sphi %s2909_s28, %s3729_s28   ;;  %s2799_s27 = sphi %s2907_s27, %s3728_s27   ;;  %s2795_s26 = sphi %s2905_s26, %s3727_s26   ;;  %s2791_s25 = sphi %s2903_s25, %s3726_s25  }
  0x15   : > { %s366_s30 = sshll.u32 %s2805_s29, 4  ;;  %p1893_p0 = scmp.ge.s32.totalorder %s2803_s28, 1  ;;  %s2929_s30 = int_to_ptr.vmem [resolvable:$true] %s366_s30 }
  0x16   : > { %p3675_p1 = scmp.eq.s32.totalorder %s2924_s14, 0  ;;  %p353_p2 = scmp.lt.s32.totalorder %s2803_s28, 3 }
  0x17   : > { %s2806_s16 = smov [#allocation13]   ;;  %s2807_s19 = smov [#allocation16]  }
  0x18   : > { %p2931_p3 = pnand %p1893_p0, %p353_p2  ;;  %s387_s17 = sshll.u32 %s2806_s16, 4  ;;  %s2938_s17 = int_to_ptr.vmem [resolvable:$true] %s387_s17 }
  0x19   : > { %s412_s20 = sshll.u32 %s2807_s19, 4  ;;  %s3692_s1 = sld [smem:[#allocation41_spill]]  ;;  %s2946_s20 = int_to_ptr.vmem [resolvable:$true] %s412_s20 }
  0x1a   : > { %s3689_s15 = scalar_select %p2931_p3, 1, 0 }
  0x1b   : > { %p2109_p5 = pneg %p2931_p3 }
  0x1c   : > { %3690 = sst [smem:[#allocation39_spill]] %s3689_s15 }
  0x1d   : > { %p2942_p6 = pnand %p2109_p5, %p3675_p1 }
  0x1f   : > { %s2343_s23 = scalar_lea.hbm %s3692_s1, 16  ;;  %p2956_p8 = pneg %p2942_p6 }
  0x20   : > { %p2344_p7 = scmp.ne.s32.totalorder %s3692_s1, %s2343_s23  ;;  %p2350_p11 = scmp.lt.u32.totalorder %s2343_s23, %s3692_s1 }
  0x22   : > { %p2346_p9 = pnand %p2956_p8, %p2344_p7 }
  0x24   : > { %p2347_p10 = pneg %p2346_p9 }
  0x26   : > { %p2352_p12 = pnand %p2350_p11, %p2347_p10 }
  0x28   : > { %2355 = shalt.err (!%p2352_p12)
}
  0x29   : > { %s2356_s21 = scalar_lea.vmem %s2929_s30, 16  ;;  %s2363_s22 = scalar_lea.vmem %s2929_s30, 32 }
  0x2a   : > { %p2357_p13 = scmp.ne.s32.totalorder %s2929_s30, %s2356_s21  ;;  %p2364_p5 = scmp.lt.s32.totalorder %s2929_s30, %s2929_s30 }
  0x2b   : > { %p2365_p7 = scmp.lt.s32.totalorder %s2363_s22, %s2356_s21 }
  0x2c   : > { %p2359_p0 = pnand %p2357_p13, %p2956_p8 }
  0x2d   : > { %p2366_p9 = por %p2365_p7, %p2364_p5 }
  0x2e   : > { %p2360_p2 = pneg %p2359_p0 }
  0x30   : > { %p2367_p4 = pnand %p2366_p9, %p2360_p2 }
  0x32   : > { %2370 = shalt.err (!%p2367_p4)
}
  0x33   : > { %2112 = dma.hbm_to_vmem [thread:$0]  (!%p2942_p6), %s3692_s1, 16, %s2929_s30, [#allocation11]  }
  0x34   : > { %s3694_s3 = sld [smem:[#allocation42_spill]] }
  0x3a   : > { %s2371_s19 = scalar_lea.hbm %s3694_s3, 1024 }
  0x3b   : > { %p2372_p10 = scmp.ne.s32.totalorder %s3694_s3, %s2371_s19  ;;  %p2378_p4 = scmp.lt.u32.totalorder %s2371_s19, %s3694_s3 }
  0x3d   : > { %p2374_p11 = pnand %p2372_p10, %p2956_p8 }
  0x3f   : > { %p2375_p12 = pneg %p2374_p11 }
  0x41   : > { %p2380_p13 = pnand %p2378_p4, %p2375_p12 }
  0x43   : > { %2383 = shalt.err (!%p2380_p13)
}
  0x44   : > { %s2384_s30 = scalar_lea.vmem %s2938_s17, 1024  ;;  %p2392_p7 = scmp.lt.s32.totalorder %s2938_s17, %s2938_s17 }
  0x45   : > { %p2385_p0 = scmp.ne.s32.totalorder %s2938_s17, %s2384_s30  ;;  %p2393_p9 = scmp.lt.s32.totalorder %s2384_s30, %s2384_s30 }
  0x47   : > { %p2387_p2 = pnand %p2385_p0, %p2956_p8  ;;  %p2394_p10 = por %p2393_p9, %p2392_p7 }
  0x49   : > { %p2388_p5 = pneg %p2387_p2 }
  0x4b   : > { %p2395_p11 = pnand %p2394_p10, %p2388_p5 }
  0x4d   : > { %2398 = shalt.err (!%p2395_p11)
}
  0x4e   : > { %s3673_s13 = smov 128   ;;  %s3674_s15 = smov 8  }
  0x4f   : > { %2118 = dma.hbm_to_vmem [thread:$0]  (!%p2942_p6), %s3694_s3, 1024, %s2938_s17, [#allocation14], %s3673_s13, %s3673_s13, %s3674_s15  }
  0x50   : > { %s3695_s5 = sld [smem:[#allocation43_spill]] }
  0x56   : > { %s2399_s19 = scalar_lea.hbm %s3695_s5, 16 }
  0x57   : > { %p2400_p12 = scmp.ne.s32.totalorder %s3695_s5, %s2399_s19  ;;  %p2406_p0 = scmp.lt.u32.totalorder %s2399_s19, %s3695_s5 }
  0x59   : > { %p2402_p4 = pnand %p2400_p12, %p2956_p8 }
  0x5b   : > { %p2403_p13 = pneg %p2402_p4 }
  0x5d   : > { %p2408_p2 = pnand %p2406_p0, %p2403_p13 }
  0x5f   : > { %2411 = shalt.err (!%p2408_p2)
}
  0x60   : > { %s2412_s17 = scalar_lea.vmem %s2946_s20, 16  ;;  %s2419_s12 = scalar_lea.vmem %s2946_s20, 32 }
  0x61   : > { %p2413_p5 = scmp.ne.s32.totalorder %s2946_s20, %s2412_s17  ;;  %p2420_p10 = scmp.lt.s32.totalorder %s2946_s20, %s2946_s20 }
  0x62   : > { %p2421_p11 = scmp.lt.s32.totalorder %s2419_s12, %s2412_s17 }
  0x63   : > { %p2415_p7 = pnand %p2413_p5, %p2956_p8 }
  0x64   : > { %p2422_p12 = por %p2421_p11, %p2420_p10 }
  0x65   : > { %p2416_p9 = pneg %p2415_p7 }
  0x67   : > { %p2423_p4 = pnand %p2422_p12, %p2416_p9 }
  0x69   : > { %2426 = shalt.err (!%p2423_p4)
}
  0x6a   : > { %2124 = dma.hbm_to_vmem [thread:$0]  (!%p2942_p6), %s3695_s5, 16, %s2946_s20, [#allocation17]  }
  0x6b   : > { %s2810_s24 = smov [#allocation19]   ;;  %s2811_s19 = smov [#allocation22]  }
  0x6c   : > { %s435_s29 = sshll.u32 %s2810_s24, 4  ;;  %s459_s21 = sshll.u32 %s2811_s19, 4  ;;  %s436_s29 = int_to_ptr.vmem [resolvable:$true] %s435_s29  ;;  %s460_s21 = int_to_ptr.vmem [resolvable:$true] %s459_s21 }
  0x6d   : > { %s2427_s17 = scalar_lea.hbm %s3663_s7, 320 }
  0x6e   : > { %p2428_p13 = scmp.ne.s32.totalorder %s3663_s7, %s2427_s17  ;;  %p2434_p5 = scmp.lt.u32.totalorder %s2427_s17, %s3663_s7 }
  0x70   : > { %p2430_p0 = pnand %p2428_p13, %p2956_p8 }
  0x72   : > { %p2431_p2 = pneg %p2430_p0 }
  0x74   : > { %p2436_p7 = pnand %p2434_p5, %p2431_p2 }
  0x76   : > { %2439 = shalt.err (!%p2436_p7)
}
  0x77   : > { %s2440_s20 = scalar_lea.vmem %s436_s29, 320  ;;  %p2448_p12 = scmp.lt.s32.totalorder %s436_s29, %s436_s29 }
  0x78   : > { %p2441_p9 = scmp.ne.s32.totalorder %s436_s29, %s2440_s20  ;;  %p2449_p4 = scmp.lt.s32.totalorder %s2440_s20, %s2440_s20 }
  0x7a   : > { %p2443_p10 = pnand %p2441_p9, %p2956_p8  ;;  %p2450_p1 = por %p2449_p4, %p2448_p12 }
  0x7c   : > { %p2444_p11 = pneg %p2443_p10 }
  0x7e   : > { %p2451_p3 = pnand %p2450_p1, %p2444_p11 }
  0x80   : > { %2454 = shalt.err (!%p2451_p3)
}
  0x81   : > { %s3677_s13 = smov 64   ;;  %s3679_s23 = smov 4  }
  0x82   : > { %2130 = dma.hbm_to_vmem [thread:$0]  (!%p2942_p6), %s3663_s7, 320, %s436_s29, [#allocation20], %s3677_s13, %s3677_s13, %s3679_s23  }
  0x83   : > { %s2455_s30 = scalar_lea.hbm %s3665_s9, 256 }
  0x84   : > { %p2456_p1 = scmp.ne.s32.totalorder %s3665_s9, %s2455_s30  ;;  %p2462_p0 = scmp.lt.u32.totalorder %s2455_s30, %s3665_s9 }
  0x86   : > { %p2458_p3 = pnand %p2456_p1, %p2956_p8 }
  0x88   : > { %p2459_p13 = pneg %p2458_p3 }
  0x8a   : > { %p2464_p2 = pnand %p2462_p0, %p2459_p13 }
  0x8c   : > { %2467 = shalt.err (!%p2464_p2)
}
  0x8d   : > { %s2468_s15 = scalar_lea.vmem %s460_s21, 256  ;;  %p2476_p10 = scmp.lt.s32.totalorder %s460_s21, %s460_s21 }
  0x8e   : > { %p2469_p5 = scmp.ne.s32.totalorder %s460_s21, %s2468_s15  ;;  %p2477_p11 = scmp.lt.s32.totalorder %s2468_s15, %s2468_s15 }
  0x90   : > { %p2471_p7 = pnand %p2469_p5, %p2956_p8  ;;  %p2478_p12 = por %p2477_p11, %p2476_p10 }
  0x92   : > { %p2472_p9 = pneg %p2471_p7 }
  0x94   : > { %p2479_p4 = pnand %p2478_p12, %p2472_p9 }
  0x96   : > { %2482 = shalt.err (!%p2479_p4)
}
  0x97   : > { %s3696_s29 = smov 8   ;;  %s3697_s24 = smov 128  }
  0x98   : > { %2136 = dma.hbm_to_vmem [thread:$0]  (!%p2942_p6), %s3665_s9, 256, %s460_s21, [#allocation23], %s3697_s24, %s3697_s24, %s3696_s29  }
  0x99   : > { %s2814_s30 = smov [#allocation12]   ;;  %s2815_s12 = smov [#allocation15]  }
  0x9a   : > { %s377_s17 = sshll.u32 %s2814_s30, 4  ;;  %s401_s1 = sshll.u32 %s2815_s12, 4  ;;  %s378_s17 = int_to_ptr.vmem [resolvable:$true] %s377_s17  ;;  %s402_s1 = int_to_ptr.vmem [resolvable:$true] %s401_s1 }
  0x9b   : > { %s2483_s13 = scalar_lea.hbm %s3658_s2, 16 }
  0x9c   : > { %p2484_p1 = scmp.ne.s32.totalorder %s3658_s2, %s2483_s13  ;;  %p2490_p0 = scmp.lt.u32.totalorder %s2483_s13, %s3658_s2 }
  0x9e   : > { %p2486_p3 = pnand %p2484_p1, %p2956_p8 }
  0xa0   : > { %p2487_p13 = pneg %p2486_p3 }
  0xa2   : > { %p2492_p2 = pnand %p2490_p0, %p2487_p13 }
  0xa4   : > { %2495 = shalt.err (!%p2492_p2)
}
  0xa5   : > { %s2496_s21 = scalar_lea.vmem %s378_s17, 16  ;;  %s2503_s29 = scalar_lea.vmem %s378_s17, 32 }
  0xa6   : > { %p2497_p5 = scmp.ne.s32.totalorder %s378_s17, %s2496_s21  ;;  %p2504_p10 = scmp.lt.s32.totalorder %s378_s17, %s378_s17 }
  0xa7   : > { %p2505_p11 = scmp.lt.s32.totalorder %s2503_s29, %s2496_s21 }
  0xa8   : > { %p2499_p7 = pnand %p2497_p5, %p2956_p8 }
  0xa9   : > { %p2506_p12 = por %p2505_p11, %p2504_p10 }
  0xaa   : > { %p2500_p9 = pneg %p2499_p7 }
  0xac   : > { %p2507_p4 = pnand %p2506_p12, %p2500_p9 }
  0xae   : > { %2510 = shalt.err (!%p2507_p4)
}
  0xaf   : > { %2115 = dma.hbm_to_vmem [thread:$0]  (!%p2942_p6), %s3658_s2, 16, %s378_s17, [#allocation11]  }
  0xb0   : > { %s2511_s24 = scalar_lea.hbm %s3660_s4, 64 }
  0xb1   : > { %p2512_p1 = scmp.ne.s32.totalorder %s3660_s4, %s2511_s24  ;;  %p2518_p0 = scmp.lt.u32.totalorder %s2511_s24, %s3660_s4 }
  0xb3   : > { %p2514_p3 = pnand %p2512_p1, %p2956_p8 }
  0xb5   : > { %p2515_p13 = pneg %p2514_p3 }
  0xb7   : > { %p2520_p2 = pnand %p2518_p0, %p2515_p13 }
  0xb9   : > { %2523 = shalt.err (!%p2520_p2)
}
  0xba   : > { %s2524_s15 = scalar_lea.vmem %s402_s1, 64  ;;  %p2532_p10 = scmp.lt.s32.totalorder %s402_s1, %s402_s1 }
  0xbb   : > { %p2525_p5 = scmp.ne.s32.totalorder %s402_s1, %s2524_s15  ;;  %p2533_p11 = scmp.lt.s32.totalorder %s2524_s15, %s2524_s15 }
  0xbd   : > { %p2527_p7 = pnand %p2525_p5, %p2956_p8  ;;  %p2534_p12 = por %p2533_p11, %p2532_p10 }
  0xbf   : > { %p2528_p9 = pneg %p2527_p7 }
  0xc1   : > { %p2535_p4 = pnand %p2534_p12, %p2528_p9 }
  0xc3   : > { %2538 = shalt.err (!%p2535_p4)
}
  0xc4   : > { %2121 = dma.hbm_to_vmem [thread:$0]  (!%p2942_p6), %s3660_s4, 64, %s402_s1, [#allocation14]  }
  0xc5   : > { %s2816_s21 = smov [#allocation18]   ;;  %s2817_s3 = smov [#allocation21]  }
  0xc6   : > { %s422_s29 = sshll.u32 %s2816_s21, 4  ;;  %s449_s23 = sshll.u32 %s2817_s3, 4  ;;  %s423_s29 = int_to_ptr.vmem [resolvable:$true] %s422_s29  ;;  %s450_s23 = int_to_ptr.vmem [resolvable:$true] %s449_s23 }
  0xc7   : > { %s2539_s24 = scalar_lea.hbm %s3662_s6, 1024 }
  0xc8   : > { %p2540_p1 = scmp.ne.s32.totalorder %s3662_s6, %s2539_s24  ;;  %p2546_p0 = scmp.lt.u32.totalorder %s2539_s24, %s3662_s6 }
  0xca   : > { %p2542_p3 = pnand %p2540_p1, %p2956_p8 }
  0xcc   : > { %p2543_p13 = pneg %p2542_p3 }
  0xce   : > { %p2548_p2 = pnand %p2546_p0, %p2543_p13 }
  0xd0   : > { %2551 = shalt.err (!%p2548_p2)
}
  0xd1   : > { %s2552_s1 = scalar_lea.vmem %s423_s29, 1024  ;;  %p2560_p10 = scmp.lt.s32.totalorder %s423_s29, %s423_s29 }
  0xd2   : > { %p2553_p5 = scmp.ne.s32.totalorder %s423_s29, %s2552_s1  ;;  %p2561_p11 = scmp.lt.s32.totalorder %s2552_s1, %s2552_s1 }
  0xd4   : > { %p2555_p7 = pnand %p2553_p5, %p2956_p8  ;;  %p2562_p12 = por %p2561_p11, %p2560_p10 }
  0xd6   : > { %p2556_p9 = pneg %p2555_p7 }
  0xd8   : > { %p2563_p4 = pnand %p2562_p12, %p2556_p9 }
  0xda   : > { %2566 = shalt.err (!%p2563_p4)
}
  0xdb   : > { %s3698_s15 = smov 4   ;;  %s3699_s17 = smov 64  }
  0xdc   : > { %2127 = dma.hbm_to_vmem [thread:$0]  (!%p2942_p6), %s3662_s6, 1024, %s423_s29, [#allocation17], %s3699_s17, %s3699_s17, %s3698_s15  }
  0xdd   : > { %s2567_s13 = scalar_lea.hbm %s3664_s8, 16 }
  0xde   : > { %p2568_p1 = scmp.ne.s32.totalorder %s3664_s8, %s2567_s13  ;;  %p2574_p0 = scmp.lt.u32.totalorder %s2567_s13, %s3664_s8 }
  0xe0   : > { %p2570_p3 = pnand %p2568_p1, %p2956_p8 }
  0xe2   : > { %p2571_p13 = pneg %p2570_p3 }
  0xe4   : > { %p2576_p2 = pnand %p2574_p0, %p2571_p13 }
  0xe6   : > { %2579 = shalt.err (!%p2576_p2)
}
  0xe7   : > { %s2580_s20 = scalar_lea.vmem %s450_s23, 16  ;;  %s2587_s29 = scalar_lea.vmem %s450_s23, 32 }
  0xe8   : > { %p2581_p5 = scmp.ne.s32.totalorder %s450_s23, %s2580_s20  ;;  %p2588_p10 = scmp.lt.s32.totalorder %s450_s23, %s450_s23 }
  0xe9   : > { %p2589_p11 = scmp.lt.s32.totalorder %s2587_s29, %s2580_s20 }
  0xea   : > { %p2583_p7 = pnand %p2581_p5, %p2956_p8 }
  0xeb   : > { %p2590_p12 = por %p2589_p11, %p2588_p10 }
  0xec   : > { %p2584_p9 = pneg %p2583_p7 }
  0xee   : > { %p2591_p4 = pnand %p2590_p12, %p2584_p9 }
  0xf0   : > { %2594 = shalt.err (!%p2591_p4)
}
  0xf1   : > { %2133 = dma.hbm_to_vmem [thread:$0]  (!%p2942_p6), %s3664_s8, 16, %s450_s23, [#allocation20]  }
  0xf2   : > { %s2818_s21 = smov [#allocation24]   ;;  %s2819_s5 = smov [#allocation25]  }
  0xf3   : > { %s473_s3 = sshll.u32 %s2818_s21, 4  ;;  %s483_s13 = sshll.u32 %s2819_s5, 4  ;;  %s474_s3 = int_to_ptr.vmem [resolvable:$true] %s473_s3  ;;  %s484_s13 = int_to_ptr.vmem [resolvable:$true] %s483_s13 }
  0xf4   : > { %s2595_s30 = scalar_lea.hbm %s3666_s10, 16 }
  0xf5   : > { %p2596_p1 = scmp.ne.s32.totalorder %s3666_s10, %s2595_s30  ;;  %p2602_p0 = scmp.lt.u32.totalorder %s2595_s30, %s3666_s10 }
  0xf7   : > { %p2598_p3 = pnand %p2596_p1, %p2956_p8 }
  0xf9   : > { %p2599_p13 = pneg %p2598_p3 }
  0xfb   : > { %p2604_p2 = pnand %p2602_p0, %p2599_p13 }
  0xfd   : > { %2607 = shalt.err (!%p2604_p2)
}
  0xfe   : > { %s2608_s23 = scalar_lea.vmem %s474_s3, 16  ;;  %s2615_s19 = scalar_lea.vmem %s474_s3, 32 }
  0xff   : > { %p2609_p5 = scmp.ne.s32.totalorder %s474_s3, %s2608_s23  ;;  %p2616_p10 = scmp.lt.s32.totalorder %s474_s3, %s474_s3 }
 0x100   : > { %p2617_p11 = scmp.lt.s32.totalorder %s2615_s19, %s2608_s23 }
 0x101   : > { %p2611_p7 = pnand %p2609_p5, %p2956_p8 }
 0x102   : > { %p2618_p12 = por %p2617_p11, %p2616_p10 }
 0x103   : > { %p2612_p9 = pneg %p2611_p7 }
 0x105   : > { %p2619_p4 = pnand %p2618_p12, %p2612_p9 }
 0x107   : > { %2622 = shalt.err (!%p2619_p4)
}
 0x108   : > { %2139 = dma.hbm_to_vmem [thread:$0]  (!%p2942_p6), %s3666_s10, 16, %s474_s3, [#allocation23]  }
 0x109   : > { %s2623_s30 = scalar_lea.hbm %s3667_s11, 1024 }
 0x10a   : > { %p2624_p1 = scmp.ne.s32.totalorder %s3667_s11, %s2623_s30  ;;  %p2630_p0 = scmp.lt.u32.totalorder %s2623_s30, %s3667_s11 }
 0x10c   : > { %p2626_p3 = pnand %p2624_p1, %p2956_p8 }
 0x10e   : > { %p2627_p13 = pneg %p2626_p3 }
 0x110   : > { %p2632_p2 = pnand %p2630_p0, %p2627_p13 }
 0x112   : > { %2635 = shalt.err (!%p2632_p2)
}
 0x113   : > { %s2636_s23 = scalar_lea.vmem %s484_s13, 1024  ;;  %p2644_p10 = scmp.lt.s32.totalorder %s484_s13, %s484_s13 }
 0x114   : > { %p2637_p5 = scmp.ne.s32.totalorder %s484_s13, %s2636_s23  ;;  %p2645_p11 = scmp.lt.s32.totalorder %s2636_s23, %s2636_s23 }
 0x116   : > { %p2639_p7 = pnand %p2637_p5, %p2956_p8  ;;  %p2646_p12 = por %p2645_p11, %p2644_p10 }
 0x118   : > { %p2640_p9 = pneg %p2639_p7 }
 0x11a   : > { %p2647_p4 = pnand %p2646_p12, %p2640_p9 }
 0x11c   : > { %2650 = shalt.err (!%p2647_p4)
}
 0x11d   : > { %2142 = dma.hbm_to_vmem [thread:$0]  (!%p2942_p6), %s3667_s11, 1024, %s484_s13, [#allocation26], %s3699_s17, %s3699_s17, %s3698_s15  }
 0x11e   : > { %s1892_s18 = sadd.s32 4294967294, %s2803_s28   ;;  %s3186_s16 = sadd.s32 1, %s2803_s28  }
 0x11f   : > { %s46_s21 = sadd.s32 1, %s2799_s27  ;;  %s43_s5 = ssub.s32 %s2803_s28, %s3186_s16 }
 0x120   : > { %p53_p8 = scmp.ne.s32.totalorder %s2799_s27, %s2795_s26  ;;  %p44_p1 = scmp.eq.s32.totalorder %s43_s5, 0 }
 0x121   : > { %p54_p3 = scmp.eq.s32.totalorder %s2803_s28, 0  ;;  %p59_p13 = scmp.ne.s32.totalorder %s2795_s26, %s2791_s25 }
 0x122   : > { %p314_p0 = scmp.eq.s32.totalorder %s2924_s14, 1  ;;  %p3700_p5 = scmp.eq.s32.totalorder %s2924_s14, 0 }
 0x123   : > { %s3198_s24 = scalar_select %p44_p1, %s2799_s27, %s46_s21  }
 0x124   : > { %p55_p2 = por %p54_p3, %p53_p8  ;;  %p3202_p7 = por %p3700_p5, %p59_p13 }
 0x125   : > { %p3206_p6 = por %p314_p0, %p53_p8  ;;  %p320_p9 = scmp.eq.s32.totalorder %s1892_s18, 1 }
 0x126   : > { %p2165_p10 = scmp.lt.s32.totalorder %s2803_s28, 2  ;;  %s497_s17 = sand.u32 1, %s2799_s27  }
 0x127   : > { %s3702_s15 = scalar_select %p3206_p6, 1, 0 }
 0x128   : > { %p3212_p11 = por %p320_p9, %p59_p13  ;;  %s1906_s30 = sshll.u32 %s497_s17, 3 }
 0x129   : > { %s1907_s12 = sshll.u32 %s2803_s28, 7  ;;  %s3704_s0 = sld [smem:[#allocation40_spill]] }
 0x12a   : > { %s3703_s13 = scalar_select %p3212_p11, 1, 0 }
 0x12b   : > { %s501_s23 = scalar_lea.vmem [#allocation7], %s1906_s30  ;;  %p3222_p12 = pnand %p2165_p10, %p55_p2 }
 0x12c   : > { %s508_s3 = sshll.u32 %s501_s23, 4  ;;  %s498_s18 = scalar_lea.sflag [#allocation8], %s497_s17  ;;  %s3226_s3 = int_to_ptr.vmem [resolvable:$true] %s508_s3 }
 0x12d   : > { %p2653_p8 = pneg %p3222_p12 }
 0x12f   : > { %s3220_s1 = scalar_lea.hbm %s3704_s0, %s1907_s12  ;;  %s2656_s12 = scalar_lea.hbm %s3704_s0, 256 }
 0x130   : > { %s2651_s21 = scalar_lea.hbm %s3220_s1, 128  ;;  %p2657_p13 = scmp.lt.u32.totalorder %s3220_s1, %s3704_s0 }
 0x131   : > { %p2652_p4 = scmp.ne.s32.totalorder %s3220_s1, %s2651_s21  ;;  %p2658_p0 = scmp.lt.u32.totalorder %s2656_s12, %s2651_s21 }
 0x132   : > { %p2660_p5 = scmp.lt.u32.totalorder %s2651_s21, %s3220_s1 }
 0x133   : > { %p2654_p1 = pnand %p2653_p8, %p2652_p4  ;;  %p2659_p2 = por %p2658_p0, %p2657_p13 }
 0x135   : > { %p2655_p3 = pneg %p2654_p1  ;;  %p2661_p9 = por %p2660_p5, %p2659_p2 }
 0x137   : > { %p2662_p10 = pnand %p2661_p9, %p2655_p3 }
 0x139   : > { %2665 = shalt.err (!%p2662_p10)
}
 0x13a   : > { %s2666_s17 = scalar_lea.vmem %s3226_s3, 128  ;;  %s2820_s23 = smov [#allocation7]  }
 0x13b   : > { %p2667_p4 = scmp.ne.s32.totalorder %s3226_s3, %s2666_s17  ;;  %s2671_s5 = sshll.u32 %s2820_s23, 4  ;;  %s2672_s5 = int_to_ptr.vmem [resolvable:$false] %s2671_s5 }
 0x13c   : > { %s2673_s30 = scalar_lea.vmem %s2672_s5, 256  ;;  %p2674_p6 = scmp.lt.s32.totalorder %s3226_s3, %s2672_s5 }
 0x13d   : > { %p2669_p1 = pnand %p2667_p4, %p2653_p8  ;;  %p2675_p13 = scmp.lt.s32.totalorder %s2673_s30, %s2666_s17 }
 0x13f   : > { %p2670_p11 = pneg %p2669_p1  ;;  %p2676_p0 = por %p2675_p13, %p2674_p6 }
 0x141   : > { %p2677_p2 = pnand %p2676_p0, %p2670_p11 }
 0x143   : > { %2680 = shalt.err (!%p2677_p2)
}
 0x144   : > { %2146 = dma.hbm_to_vmem [thread:$0]  (!%p3222_p12), %s3220_s1, 128, %s3226_s3, %s498_s18  }
 0x145   : > { %s3706_s21 = sld [smem:[#allocation39_spill]] }
 0x14b   : > { %p3707_p3 = scmp.ne.s32.totalorder %s3706_s21, 0 }
 0x14c   : > { %s3256_s12 = sand.u32 (!%p3707_p3), 1, %s2795_s26  }
 0x14d   : > { %517 = sbr.rel (%p3707_p3) target bundleno = 1865 (0x749), region = 68  ;;  %s3259_s20 = sshll.u32 (!%p3707_p3), %s3256_s12, 3 }
 0x14e   : > { %s520_s29 = scalar_lea.sflag (!%p3707_p3), [#allocation8], %s3256_s12  ;;  %s523_s17 = scalar_lea.vmem (!%p3707_p3), [#allocation7], %s3259_s20 }
 0x154   : > { %2754 = dma.done.wait (%p3202_p7), %s520_s29, 128  }
 0x155   : > { %2756 = vsyncadd (%p3202_p7), %s520_s29, 4294967168  ;;  %p3708_p6 = scmp.eq.s32.totalorder %s2924_s14, 0 }
 0x157   : > { %2758 = dma.done.wait (%p3708_p6), [#allocation11], 32   ;;  %p3709_p11 = pmov %p3708_p6 }
 0x158   : > { %p3710_p12 = pmov %p3708_p6 }
 0x159   : > { %2760 = vsyncadd (%p3709_p11), [#allocation11], 4294967264 }
 0x15a   : > { %2762 = dma.done.wait (%p3710_p12), [#allocation14], 1088   ;;  %p3711_p8 = pmov %p3708_p6 }
 0x15b   : > { %p3712_p5 = pmov %p3708_p6 }
 0x15c   : > { %2764 = vsyncadd (%p3711_p8), [#allocation14], 4294966208 }
 0x15d   : > { %2766 = dma.done.wait (%p3712_p5), [#allocation17], 1040   ;;  %p3713_p9 = pmov %p3712_p5 }
 0x15e   : > { %p3714_p7 = pmov %p3712_p5 }
 0x15f   : > { %2768 = vsyncadd (%p3713_p9), [#allocation17], 4294966256 }
 0x160   : > { %2770 = dma.done.wait (%p3714_p7), [#allocation20], 336   ;;  %p3715_p10 = pmov %p3712_p5 }
 0x161   : > { %p3716_p4 = pmov %p3712_p5 }
 0x162   : > { %2772 = vsyncadd (%p3715_p10), [#allocation20], 4294966960 }
 0x163   : > { %2774 = dma.done.wait (%p3716_p4), [#allocation23], 272   ;;  %p3717_p1 = pmov %p3716_p4 }
 0x165   : > { %2776 = vsyncadd (%p3717_p1), [#allocation23], 4294967024  ;;  %p3718_p13 = pmov %p3717_p1 }
 0x166   : > { %p3719_p0 = pmov %p3717_p1 }
 0x167   : > { %2778 = dma.done.wait (%p3718_p13), [#allocation26], 1024  }
 0x168   : > { %2780 = vsyncadd (%p3719_p0), [#allocation26], 4294966272  ;;  %vm617_vm0 = vcmask 523264   ;;  %v3291_v0 = vld [vmem:[%s523_s17] sm:$0xff]  ;;  %v2268_v8 = vld [vmem:[#allocation13] ss:$8 sps:$4 sm:$0xff]   ;;  %v757_v37 = vlaneseq }
 0x169   : > { %v619_v1 = vsel %vm617_vm0, %v3291_v0, 0.0  ;;  %v2266_v7 = vld [vmem:[#allocation13 + $0x4] ss:$8 sps:$4 sm:$0xff]   ;;  %v2269_v9 = vld [vmem:[#allocation13 + $0x14] ss:$8 sps:$4 sm:$0xff]   ;;  %v2821_v11 = vmov 0  }
 0x16a   : > { %620 = vadd.xlane.f32.xlu0 %v619_v1  ;;  %701 = vmatprep.subr.bf16.mxu0 %v2266_v7  ;;  %v2271_v10 = vld [vmem:[#allocation13 + $0x10] ss:$8 sps:$4 sm:$0xff]   ;;  %v2272_v12 = vld [vmem:[#allocation13 + $0x24] ss:$8 sps:$4 sm:$0xff]   ;;  %v2274_v13 = vld [vmem:[#allocation13 + $0x20] ss:$8 sps:$4 sm:$0xff]  }
 0x16b   : > { %702 = vmatpush1.bf16.msra.mxu0 %v2268_v8  ;;  %733 = vmatprep.mubr.bf16.mxu0 %v2821_v11  ;;  %v2275_v14 = vld [vmem:[#allocation13 + $0x34] ss:$8 sps:$4 sm:$0xff]   ;;  %v2277_v15 = vld [vmem:[#allocation13 + $0x30] ss:$8 sps:$4 sm:$0xff]   ;;  %v2278_v26 = vld [vmem:[#allocation18] sm:$0xff]   ;;  %v2822_v27 = vmov 0.0  }
 0x16c   : > { %703 = vmatprep.subr.bf16.mxu0 %v2269_v9  ;;  %2235 = vset.pattern.permute.xlu1 %v2821_v11  ;;  %v1923_v20 = vld [vmem:[#allocation10] ss:$0 sm:$0xff]  ;;  %v1924_v22 = vld [vmem:[#allocation12] ss:$0 sm:$0xff]  ;;  %v2279_v28 = vld [vmem:[#allocation18 + $0x8] sm:$0xff]   ;;  %vm2823_vm1 = vmmov 0  }
 0x16d   : > { %2001 = vmatprep.subr.bf16.mxu1 %v2822_v27  ;;  %v2280_v29 = vld [vmem:[#allocation18 + $0x10] sm:$0xff]   ;;  %v2281_v30 = vld [vmem:[#allocation18 + $0x18] sm:$0xff]   ;;  %v2282_v31 = vld [vmem:[#allocation18 + $0x20] sm:$0xff]   ;;  %2017 = vmatprep.mubr.msk.bf16.mxu1 %vm2823_vm1, %v2822_v27  ;;  %v3316_v38 = vshrl.u32 %v757_v37, 7  ;;  %vm754_vm2 = vcmask 1042432   ;;  %vm777_vm3 = vcmask 1046528  }
 0x16e   : > { %2002 = vmatpush3.bf16.msra.mxu1 %v2278_v26  ;;  %v2283_v32 = vld [vmem:[#allocation18 + $0x28] sm:$0xff]   ;;  %v2284_v33 = vld [vmem:[#allocation18 + $0x30] sm:$0xff]   ;;  %v2285_v34 = vld [vmem:[#allocation18 + $0x38] sm:$0xff]   ;;  %vm791_vm4 = vcmask 1045504   ;;  %vm805_vm5 = vcmask 1044480   ;;  %vm958_vm6 = vcmask 1041408  }
 0x16f   : > { %704 = vmatpush1.bf16.msra.mxu0 %v2271_v10  ;;  %2003 = vmatprep.subr.bf16.mxu1 %v2822_v27  ;;  %v2286_v35 = vld [vmem:[#allocation19] sm:$0xff]   ;;  %v2287_v36 = vld [vmem:[#allocation19 + $0x8] sm:$0xff]   ;;  %v3319_v39 = vsub.s32 1, %v3316_v38  ;;  %v3322_v40 = vsub.s32 2, %v3316_v38  ;;  %v3325_v41 = vsub.s32 3, %v3316_v38  ;;  %v3328_v43 = vsub.s32 0, %v3316_v38 }
 0x170   : > { %705 = vmatprep.subr.bf16.mxu0 %v2272_v12  ;;  %v750_v42 = vld [vmem:[#allocation15] sm:$0xf]  ;;  %v1935_v53 = vld [vmem:[#allocation16] ss:$0 sm:$0xff]  ;;  %vm924_vm7 = vcmask 261120   ;;  %vm954_vm9 = vcmask 293888  }
 0x171   : > { %v772_v44 = vrot.slane %v750_v42, %v3319_v39  ;;  %v786_v45 = vrot.slane %v750_v42, %v3322_v40  ;;  %v800_v46 = vrot.slane %v750_v42, %v3325_v41  ;;  %v760_v48 = vrot.slane %v750_v42, %v3328_v43  ;;  %s3682_s22 = sshll.u32 %s2924_s14, 7  ;;  %s614_s1 = scalar_lea.vmem [#allocation28], %s3259_s20 }
 0x172   : > { %2004 = vmatpush3.bf16.msra.mxu1 %v2279_v28  ;;  %vm1186_vm13 = vcmp.eq.s32.totalorder %v3316_v38, 0  ;;  %vm1235_vm14 = vcmp.eq.s32.totalorder %v3316_v38, 1  ;;  %vm1284_vm15 = vcmp.eq.s32.totalorder %v3316_v38, 2  ;;  %618 = vst.msk [vmem:[%s614_s1] sm:$0xff] %vm617_vm0, %v3291_v0  ;;  %s3720_s18 = sld [smem:[#allocation45_spill]]  ;;  %s1685_s5 = sshll.u32 %s614_s1, 4  ;;  %s1686_s5 = int_to_ptr.vmem [resolvable:$true] %s1685_s5 }
 0x173   : > { %706 = vmatpush1.bf16.msra.mxu0 %v2274_v13  ;;  %2005 = vmatprep.subr.bf16.mxu1 %v2822_v27  ;;  %s1659_s30 = scalar_lea.sflag [#allocation29], %s3256_s12  ;;  %s2681_s21 = scalar_lea.vmem %s1686_s5, 128 }
 0x174   : > { %707 = vmatprep.subr.bf16.mxu0 %v2275_v14  ;;  %p2682_p2 = scmp.ne.s32.totalorder %s1686_s5, %s2681_s21  ;;  %p3721_p3 = scmp.ne.s32.totalorder %s3702_s15, 0 }
 0x175   : > { %s2831_s29 = smov [#allocation28]  }
 0x176   : > { %2006 = vmatpush3.bf16.msra.mxu1 %v2280_v29  ;;  %v1016_v29 = vadd.s32 8, %v3316_v38  ;;  %p2683_p6 = pnand %p2682_p2, %p3721_p3  ;;  %s2685_s17 = sshll.u32 %s2831_s29, 4  ;;  %s2686_s17 = int_to_ptr.vmem [resolvable:$false] %s2685_s17 }
 0x177   : > { %708 = vmatpush1.bf16.msra.mxu0 %v2277_v15  ;;  %2007 = vmatprep.subr.bf16.mxu1 %v2822_v27  ;;  %s2687_s0 = scalar_lea.vmem %s2686_s17, 256  ;;  %p2688_p12 = scmp.lt.s32.totalorder %s1686_s5, %s2686_s17 }
 0x178   : > { %2021 = vmatprep.subr.bf16.mxu0 %v2822_v27  ;;  %s3585_s23 = scalar_lea.hbm %s3720_s18, %s3682_s22  ;;  %p2684_p11 = pneg %p2683_p6 }
 0x179   : > { %p2689_p8 = scmp.lt.s32.totalorder %s2687_s0, %s2681_s21 }
 0x17a   : > { %2008 = vmatpush3.bf16.msra.mxu1 %v2281_v30  ;;  %v1017_v30 = vadd.s32 16, %v3316_v38 }
 0x17b   : > { %2009 = vmatprep.subr.bf16.mxu1 %v2822_v27  ;;  %p2690_p5 = por %p2689_p8, %p2688_p12 }
 0x17d   : > { %p2691_p9 = pnand %p2690_p5, %p2684_p11 }
 0x17e   : > { %2010 = vmatpush3.bf16.msra.mxu1 %v2282_v31  ;;  %v1018_v31 = vadd.s32 24, %v3316_v38 }
 0x17f   : > { %2011 = vmatprep.subr.bf16.mxu1 %v2822_v27 }
 0x182   : > { %2012 = vmatpush3.bf16.msra.mxu1 %v2283_v32 }
 0x183   : > { %2013 = vmatprep.subr.bf16.mxu1 %v2822_v27 }
 0x186   : > { %2014 = vmatpush3.bf16.msra.mxu1 %v2284_v33 }
 0x187   : > { %2015 = vmatprep.subr.bf16.mxu1 %v2822_v27 }
 0x18a   : > { %2016 = vmatpush3.bf16.msra.mxu1 %v2285_v34 }
 0x18b   : > { %2039 = vmatprep.subr.bf16.mxu1 %v2822_v27 }
 0x1f7   : > { %v621_v2 = vpop.xlane.xlu0 %620 }
 0x1f8   : > { %v623_v3 = vmul.f32 0.015625, %v621_v2 }
 0x1fa   : > { %v624_v4 = vsub.f32 %v3291_v0, %v623_v3 }
 0x1fc   : > { %v625_v5 = vmul.f32 %v624_v4, %v624_v4 }
 0x1fe   : > { %v626_v6 = vsel %vm617_vm0, %v625_v5, 0.0 }
 0x1ff   : > { %627 = vadd.xlane.f32.xlu0 %v626_v6 }
 0x28c   : > { %v628_v16 = vpop.xlane.xlu0 %627 }
 0x28d   : > { %v629_v17 = vmul.f32 0.015625, %v628_v16 }
 0x28f   : > { %v630_v18 = vadd.f32 1e-05, %v629_v17 }
 0x291   : > { %2297 = vrsqrt.f32 %v630_v18 }
 0x29b   : > { %v2298_v19 = vpop.eup %2297 }
 0x29c   : > { %v632_v21 = vmul.f32 %v2298_v19, %v624_v4  ;;  %v2288_v19 = vld [vmem:[#allocation19 + $0x10] ss:$0 sps:$4 sm:$0x33]  }
 0x29e   : > { %v640_v23 = vmul.f32 %v1923_v20, %v632_v21  ;;  %v960_v20 = vsel %vm958_vm6, %v2288_v19, 0  ;;  %v1020_v21 = vand.u32 127, %v757_v37 }
 0x2a0   : > { %v648_v24 = vadd.f32 %v1924_v22, %v640_v23  ;;  %vm1021_vm8 = vcmp.eq.s32.totalorder %v3316_v38, %v1020_v21  ;;  %vm1022_vm10 = vcmp.eq.s32.totalorder %v1016_v29, %v1020_v21  ;;  %vm1023_vm11 = vcmp.eq.s32.totalorder %v1017_v30, %v1020_v21 }
 0x2a1   : > { %v1951_v33 = vsel %vm1022_vm10, 1.0, %v2822_v27  ;;  %v1952_v34 = vsel %vm1023_vm11, 1.0, %v2822_v27  ;;  %vm1024_vm12 = vcmp.eq.s32.totalorder %v1018_v31, %v1020_v21  ;;  %v2289_v21 = vld [vmem:[#allocation25] sm:$0xff]  }
 0x2a2   : > { %v649_v25 = vpack.c.bf16 %v648_v24, %v648_v24 }
 0x2a4   : > { %1933 = vmatmul.mubr.msk.bf16.vlgmr.msra.gmra.mrb[0].mxu0 %vm617_vm0, %v649_v25  ;;  %v1950_v25 = vsel %vm1021_vm8, 1.0, %v2822_v27 }
 0x2a5   : > { %2027 = vmatprep.mubr.msk.bf16.mxu0 %vm2823_vm1, %v2822_v27  ;;  %2022 = vmatpush3.bf16.msra.mxu0 %v2286_v35  ;;  %v1953_v35 = vsel %vm1024_vm12, 1.0, %v2822_v27 }
 0x2a6   : > { %2023 = vmatprep.subr.bf16.mxu0 %v2822_v27 }
 0x2a9   : > { %2024 = vmatpush3.bf16.msra.mxu0 %v2287_v36  ;;  %v2824_v36 = vmov 7  }
 0x2aa   : > { %2025 = vmatprep.subr.bf16.mxu0 %v2822_v27  ;;  %2242 = vset.pattern.permute.xlu0 %v2824_v36 }
 0x2ad   : > { %2026 = vmatpush3.bf16.msra.mxu0 %v960_v20 }
 0x377   : > { %v735_v47 = vpop.f32.mrb[0].mxu0 }
 0x378   : > { %v752_v49 = vrot.slane %v735_v47, 5  ;;  %v3334_v50 = vpop.f32.mrb[1].mxu0 }
 0x379   : > { %v739_v51 = vpop.f32.mrb[2].mxu0 }
 0x37a   : > { %v755_v52 = vsel %vm754_vm2, 0.0, %v752_v49  ;;  %v774_v54 = vmul.f32 %v772_v44, %v752_v49  ;;  %v788_v55 = vmul.f32 %v786_v45, %v752_v49  ;;  %v802_v56 = vmul.f32 %v800_v46, %v752_v49  ;;  %v740_v57 = vpop.f32.mrb[3].mxu0 }
 0x37b   : > { %v761_v58 = vmul.f32 %v760_v48, %v755_v52  ;;  %v773_v59 = vmul.f32 %v772_v44, %v755_v52  ;;  %v787_v60 = vmul.f32 %v786_v45, %v755_v52  ;;  %v801_v61 = vmul.f32 %v800_v46, %v755_v52  ;;  %v1945_v57 = vld [vmem:[#allocation21] ss:$0 sm:$0xff] }
 0x37c   : > { %v779_v62 = vrot.slane %v774_v54, 1  ;;  %v793_v3 = vrot.slane %v788_v55, 2  ;;  %v807_v6 = vrot.slane %v802_v56, 3  ;;  %v2825_v49 = vmov 1  }
 0x37d   : > { %v768_v63 = vadd.f32 %v1935_v53, %v761_v58  ;;  %v778_v1 = vrot.slane %v773_v59, 1  ;;  %v792_v2 = vrot.slane %v787_v60, 2  ;;  %v806_v5 = vrot.slane %v801_v61, 3 }
 0x37e   : > { %v2826_v52 = vmov 2   ;;  %v2827_v53 = vmov 3   ;;  %v2828_v54 = vmov 4   ;;  %v2829_v55 = vmov 5  }
 0x37f   : > { %v780_v4 = vsel %vm777_vm3, %v778_v1, %v779_v62  ;;  %v794_v8 = vsel %vm791_vm4, %v792_v2, %v793_v3  ;;  %v808_v10 = vsel %vm805_vm5, %v806_v5, %v807_v6  ;;  %v2830_v56 = vmov 6   ;;  %v3392_v5 = vld [vmem:[#allocation22 + $0x8] sm:$0xff] }
 0x380   : > { %v782_v7 = vadd.f32 %v780_v4, %v768_v63  ;;  %vm1382_vm2 = vcmp.eq.s32.totalorder %v3316_v38, 4  ;;  %vm1431_vm3 = vcmp.eq.s32.totalorder %v3316_v38, 5  ;;  %vm1480_vm4 = vcmp.eq.s32.totalorder %v3316_v38, 6 }
 0x381   : > { %vm1529_vm5 = vcmp.eq.s32.totalorder %v3316_v38, 7 }
 0x382   : > { %v796_v9 = vadd.f32 %v794_v8, %v782_v7 }
 0x384   : > { %v810_v12 = vadd.f32 %v808_v10, %v796_v9 }
 0x386   : > { %v1936_v13 = vmul.f32 -1.442695, %v810_v12 }
 0x388   : > { %2299 = vpow2.f32 %v1936_v13 }
 0x392   : > { %v2300_v14 = vpop.eup %2299 }
 0x393   : > { %v814_v15 = vadd.f32 1.0, %v2300_v14 }
 0x395   : > { %2301 = vrcp.f32 %v814_v15  ;;  %v1339_v15 = vsub.s32 4, %v3316_v38 }
 0x39f   : > { %v2302_v16 = vpop.eup %2301 }
 0x3a0   : > { %v3336_v17 = vmul.f32 %v2302_v16, %v810_v12 }
 0x3a2   : > { %v819_v18 = vpack.c.bf16 %v3336_v17, %v3336_v17 }
 0x3a4   : > { %2018 = vmatmul.mubr.bf16.vlgmr.msra.gmra.mrb[0].mxu1 %v819_v18 }
 0x3a5   : > { %2055 = vmatprep.mubr.msk.bf16.mxu1 %vm2823_vm1, %v2822_v27  ;;  %2040 = vmatpush3.bf16.msra.mxu1 %v2289_v21  ;;  %vm1333_vm1 = vcmp.eq.s32.totalorder %v3316_v38, 3 }
 0x3a6   : > { %2041 = vmatprep.subr.bf16.mxu1 %v2822_v27 }
 0x477   : > { %v918_v22 = vpop.f32.mrb[0].mxu1 }
 0x478   : > { %925 = vst.msk [vmem:[#allocation5] sm:$0xff] %vm924_vm7, %v918_v22  ;;  %v926_v23 = vpack.c.bf16 %v918_v22, %v918_v22  ;;  %v2019_v24 = vpop.f32.mrb[1].mxu1 }
 0x479   : > { %v921_v26 = vpop.f32.mrb[2].mxu1 }
 0x47a   : > { %v2020_v28 = vpop.f32.mrb[3].mxu1  ;;  %2028 = vmatmul.mubr.msk.bf16.vlgmr.msra.gmra.mrb[4].mxu0 %vm954_vm9, %v926_v23  ;;  %v1388_v23 = vsub.s32 5, %v3316_v38 }
 0x47b   : > { %2033 = vmatprep.mubr.msk.f32.mxu0 %vm924_vm7, %v1950_v25  ;;  %v2290_v25 = vld [vmem:[#allocation25 + $0x8] sm:$0xff]  }
 0x47c   : > { %2042 = vmatpush3.bf16.msra.mxu1 %v2290_v25 }
 0x47d   : > { %2043 = vmatprep.subr.bf16.mxu1 %v2822_v27 }
 0x47f   : > { %v1036_v32 = vld [vmem:[#allocation5] sm:$0xff] }
 0x480   : > { %2031 = vmatprep.subr.msk.mxu0 %vm924_vm7, %v1036_v32 }
 0x481   : > { %2032 = vmatpush3.xpose.msk.msra.mxu0 %vm924_vm7, %v1036_v32 }
 0x484   : > { %2034 = vmatmul.mubr.msk.f32.vlgmr.msra.gmra.mrb[8].mxu0 %vm924_vm7, %v1951_v33  ;;  %v1437_v33 = vsub.s32 6, %v3316_v38 }
 0x485   : > { %2036 = vmatprep.mubr.msk.f32.mxu0 %vm924_vm7, %v1952_v34 }
 0x488   : > { %2037 = vmatmul.mubr.msk.f32.gmra.mrb[10].mxu0 %vm924_vm7, %v1953_v35 }
 0x54d   : > { %v996_v37 = vpop.f32.mrb[4].mxu0 }
 0x54e   : > { %v2029_v42 = vpop.f32.mrb[5].mxu0  ;;  %v997_v58 = vadd.f32 %v1945_v57, %v996_v37 }
 0x54f   : > { %v999_v44 = vpop.f32.mrb[6].mxu0 }
 0x550   : > { %v2030_v45 = vpop.f32.mrb[7].mxu0  ;;  %v1003_v59 = vand.u32 2147483647, %v997_v58  ;;  %v1002_v2 = vmax.f32 %v997_v58, 0.0  ;;  %v2291_v44 = vld [vmem:[#allocation25 + $0x10] sm:$0xff]   ;;  %v2293_v58 = vld [vmem:[#allocation25 + $0x20] sm:$0xff]  }
 0x551   : > { %2044 = vmatpush3.bf16.msra.mxu1 %v2291_v44 }
 0x552   : > { %v1004_v60 = vsub.f32 0.0, %v1003_v59  ;;  %2045 = vmatprep.subr.bf16.mxu1 %v2822_v27 }
 0x554   : > { %v1005_v61 = vmul.f32 1.442695, %v1004_v60 }
 0x556   : > { %2303 = vpow2.f32 %v1005_v61 }
 0x557   : > { %v2035_v46 = vpop.f32.mrb[8].mxu0 }
 0x558   : > { %1501 = vperm.xlu0 %2242, %v2035_v46   ;;  %1156 = vperm.xlu1 %2235, %v2035_v46   ;;  %v1118_v47 = vpop.f32.mrb[9].mxu0 }
 0x55b   : > { %v3358_v48 = vpop.f32.mrb[10].mxu0 }
 0x55c   : > { %2244 = vset.pattern.permute.xlu0 %v2825_v49  ;;  %2236 = vset.pattern.permute.xlu1 %v2825_v49  ;;  %v3362_v51 = vpop.f32.mrb[11].mxu0 }
 0x55d   : > { %1207 = vperm.xlu1 %2236, %v2035_v46   ;;  %1203 = vperm.xlu0 %2244, %v1118_v47  }
 0x560   : > { %v2304_v62 = vpop.eup %2303 }
 0x561   : > { %2237 = vset.pattern.permute.xlu1 %v2826_v52  ;;  %1223 = vperm.xlu0 %2244, %v3358_v48   ;;  %v1007_v63 = vadd.f32 1.0, %v2304_v62 }
 0x562   : > { %1256 = vperm.xlu1 %2237, %v2035_v46  }
 0x563   : > { %2305 = vlog2.f32 %v1007_v63 }
 0x565   : > { %2256 = vset.pattern.permute.xlu0 %v2821_v11 }
 0x566   : > { %2238 = vset.pattern.permute.xlu1 %v2827_v53  ;;  %1169 = vperm.xlu0 %2256, %v3362_v51  }
 0x567   : > { %1305 = vperm.xlu1 %2238, %v2035_v46  }
 0x56a   : > { %2259 = vset.pattern.permute.xlu0 %v2827_v53 }
 0x56b   : > { %2239 = vset.pattern.permute.xlu1 %v2828_v54  ;;  %1317 = vperm.xlu0 %2259, %v3362_v51  }
 0x56c   : > { %1354 = vperm.xlu1 %2239, %v2035_v46  }
 0x56d   : > { %v2306_v1 = vpop.eup %2305 }
 0x56f   : > { %2261 = vset.pattern.permute.xlu0 %v2829_v55 }
 0x570   : > { %2240 = vset.pattern.permute.xlu1 %v2829_v55  ;;  %1415 = vperm.xlu0 %2261, %v3362_v51  }
 0x571   : > { %1403 = vperm.xlu1 %2240, %v2035_v46  }
 0x574   : > { %2263 = vset.pattern.permute.xlu0 %v2830_v56 }
 0x575   : > { %2241 = vset.pattern.permute.xlu1 %v2830_v56  ;;  %1468 = vperm.xlu0 %2263, %v3358_v48  }
 0x576   : > { %1452 = vperm.xlu1 %2241, %v2035_v46  }
 0x579   : > { %2265 = vset.pattern.permute.xlu0 %v2824_v36 }
 0x57a   : > { %2243 = vset.pattern.permute.xlu1 %v2821_v11 }
 0x57b   : > { %1151 = vperm.xlu1 %2243, %v1118_v47  }
 0x57f   : > { %2245 = vset.pattern.permute.xlu1 %v2826_v52 }
 0x580   : > { %1252 = vperm.xlu1 %2245, %v1118_v47  }
 0x584   : > { %2246 = vset.pattern.permute.xlu1 %v2827_v53 }
 0x585   : > { %1301 = vperm.xlu1 %2246, %v1118_v47  }
 0x589   : > { %2247 = vset.pattern.permute.xlu1 %v2828_v54 }
 0x58a   : > { %1350 = vperm.xlu1 %2247, %v1118_v47  }
 0x58e   : > { %2248 = vset.pattern.permute.xlu1 %v2829_v55 }
 0x58f   : > { %1399 = vperm.xlu1 %2248, %v1118_v47  }
 0x593   : > { %2249 = vset.pattern.permute.xlu1 %v2830_v56 }
 0x594   : > { %1448 = vperm.xlu1 %2249, %v1118_v47  }
 0x598   : > { %2250 = vset.pattern.permute.xlu1 %v2824_v36 }
 0x599   : > { %1497 = vperm.xlu1 %2250, %v1118_v47  }
 0x59d   : > { %2251 = vset.pattern.permute.xlu1 %v2821_v11  ;;  %v1009_v11 = vmul.f32 0.6931472, %v2306_v1 }
 0x59e   : > { %1174 = vperm.xlu1 %2251, %v3358_v48  }
 0x59f   : > { %v3384_v3 = vadd.f32 %v1009_v11, %v1002_v2  ;;  %v2294_v11 = vld [vmem:[#allocation25 + $0x28] sm:$0xff]  }
 0x5a1   : > { %v3390_v4 = vrot.slane %v3384_v3, %v3328_v43  ;;  %v3399_v7 = vrot.slane %v3384_v3, %v3319_v39  ;;  %v3407_v10 = vrot.slane %v3384_v3, %v3322_v40  ;;  %v3415_v14 = vrot.slane %v3384_v3, %v3325_v41 }
 0x5a2   : > { %2252 = vset.pattern.permute.xlu1 %v2826_v52  ;;  %v3420_v16 = vmul.f32 %v3384_v3, %v3336_v17  ;;  %v3427_v20 = vrot.slane %v3384_v3, %v1339_v15  ;;  %v3441_v32 = vrot.slane %v3384_v3, %v1388_v23  ;;  %v3458_v47 = vrot.slane %v3384_v3, %v1437_v33 }
 0x5a3   : > { %1272 = vperm.xlu1 %2252, %v3358_v48   ;;  %v1142_v6 = vmul.f32 %v3390_v4, %v3392_v5  ;;  %v1195_v9 = vmul.f32 %v3399_v7, %v3392_v5  ;;  %v1244_v13 = vmul.f32 %v3407_v10, %v3392_v5  ;;  %v1293_v19 = vmul.f32 %v3415_v14, %v3392_v5 }
 0x5a4   : > { %v3432_v24 = vrot.slane %v3420_v16, %v3328_v43  ;;  %v1342_v31 = vmul.f32 %v3427_v20, %v3392_v5  ;;  %v3448_v35 = vrot.slane %v3420_v16, %v3319_v39  ;;  %v1391_v46 = vmul.f32 %v3441_v32, %v3392_v5  ;;  %v2292_v39 = vld [vmem:[#allocation25 + $0x18] sm:$0xff]  }
 0x5a5   : > { %v1145_v8 = vmul.f32 1.442695, %v1142_v6  ;;  %v1198_v12 = vmul.f32 1.442695, %v1195_v9  ;;  %v1247_v18 = vmul.f32 1.442695, %v1244_v13  ;;  %v1440_v57 = vmul.f32 %v3458_v47, %v3392_v5  ;;  %2046 = vmatpush3.bf16.msra.mxu1 %v2292_v39 }
 0x5a6   : > { %v1296_v28 = vmul.f32 1.442695, %v1293_v19  ;;  %v1345_v42 = vmul.f32 1.442695, %v1342_v31  ;;  %2047 = vmatprep.subr.bf16.mxu1 %v2822_v27  ;;  %v3480_v61 = vrot.slane %v3420_v16, %v3325_v41  ;;  %v3492_v41 = vrot.slane %v3420_v16, %v1339_v15  ;;  %v2295_v9 = vld [vmem:[#allocation25 + $0x30] sm:$0xff]  }
 0x5a7   : > { %2253 = vset.pattern.permute.xlu1 %v2827_v53  ;;  %2307 = vpow2.f32 %v1145_v8  ;;  %v1443_v1 = vmul.f32 1.442695, %v1440_v57  ;;  %v3504_v15 = vrot.slane %v3420_v16, %v1388_v23  ;;  %v3516_v23 = vrot.slane %v3420_v16, %v1437_v33 }
 0x5a8   : > { %1321 = vperm.xlu1 %2253, %v3358_v48   ;;  %2309 = vpow2.f32 %v1198_v12 }
 0x5a9   : > { %2311 = vpow2.f32 %v1247_v18  ;;  %2048 = vmatpush3.bf16.msra.mxu1 %v2293_v58 }
 0x5aa   : > { %2313 = vpow2.f32 %v1296_v28  ;;  %2049 = vmatprep.subr.bf16.mxu1 %v2822_v27 }
 0x5ab   : > { %2315 = vpow2.f32 %v1345_v42 }
 0x5ac   : > { %2254 = vset.pattern.permute.xlu1 %v2828_v54 }
 0x5ad   : > { %1370 = vperm.xlu1 %2254, %v3358_v48   ;;  %2050 = vmatpush3.bf16.msra.mxu1 %v2294_v11 }
 0x5ae   : > { %2051 = vmatprep.subr.bf16.mxu1 %v2822_v27 }
 0x5b1   : > { %2255 = vset.pattern.permute.xlu1 %v2829_v55  ;;  %v2308_v22 = vpop.eup %2307  ;;  %v1394_v55 = vmul.f32 1.442695, %v1391_v46  ;;  %2052 = vmatpush3.bf16.msra.mxu1 %v2295_v9 }
 0x5b2   : > { %1419 = vperm.xlu1 %2255, %v3358_v48   ;;  %v1148_v29 = vmul.f32 0.0, %v2308_v22  ;;  %v2310_v34 = vpop.eup %2309  ;;  %v2296_v22 = vld [vmem:[#allocation25 + $0x38] sm:$0xff]   ;;  %2053 = vmatprep.subr.bf16.mxu1 %v2822_v27 }
 0x5b3   : > { %2317 = vpow2.f32 %v1394_v55 }
 0x5b4   : > { %2319 = vpow2.f32 %v1443_v1 }
 0x5b5   : > { %2054 = vmatpush3.bf16.msra.mxu1 %v2296_v22 }
 0x5b6   : > { %2257 = vset.pattern.permute.xlu1 %v2825_v49 }
 0x5b7   : > { %1219 = vperm.xlu1 %2257, %v3362_v51  }
 0x5bb   : > { %2258 = vset.pattern.permute.xlu1 %v2826_v52  ;;  %v3466_v52 = vrot.slane %v3420_v16, %v3322_v40 }
 0x5bc   : > { %1268 = vperm.xlu1 %2258, %v3362_v51  }
 0x5c0   : > { %2260 = vset.pattern.permute.xlu1 %v2828_v54 }
 0x5c1   : > { %1366 = vperm.xlu1 %2260, %v3362_v51  }
 0x5c5   : > { %2262 = vset.pattern.permute.xlu1 %v2830_v56 }
 0x5c6   : > { %1464 = vperm.xlu1 %2262, %v3362_v51  }
 0x5ca   : > { %2264 = vset.pattern.permute.xlu1 %v2824_v36 }
 0x5cb   : > { %1513 = vperm.xlu1 %2264, %v3362_v51   ;;  %v2312_v51 = vpop.eup %2311 }
 0x5cc   : > { %v2314_v40 = vpop.eup %2313 }
 0x5cd   : > { %v2316_v8 = vpop.eup %2315 }
 0x5ce   : > { %v2318_v25 = vpop.eup %2317 }
 0x5cf   : > { %1517 = vperm.xlu1 %2264, %v3358_v48   ;;  %v1486_v48 = vsub.s32 7, %v3316_v38 }
 0x5d1   : > { %v3473_v59 = vrot.slane %v3384_v3, %v1486_v48 }
 0x5d3   : > { %v1489_v2 = vmul.f32 %v3473_v59, %v3392_v5  ;;  %v3496_v5 = vld [vmem:[#allocation22] sm:$0xff] }
 0x5d4   : > { %v1194_v44 = vmul.f32 %v3399_v7, %v3496_v5 }
 0x5d5   : > { %v1492_v12 = vmul.f32 1.442695, %v1489_v2 }
 0x5d7   : > { %v1157_v26 = vpop.permute.xlu1 %1156  ;;  %2321 = vpow2.f32 %v1492_v12  ;;  %v1502_v42 = vpop.permute.xlu0 %1501 }
 0x5d8   : > { %v1164_v30 = vmul.f32 %v3432_v24, %v1157_v26  ;;  %v1141_v26 = vmul.f32 %v3390_v4, %v3496_v5 }
 0x5da   : > { %v3443_v43 = vadd.f32 %v1164_v30, %v1148_v29 }
 0x5dc   : > { %v1208_v36 = vpop.permute.xlu1 %1207  ;;  %v1201_v37 = vmul.f32 %v2310_v34, %v3443_v43  ;;  %v1143_v34 = vmul.f32 1.442695, %v1141_v26  ;;  %v1204_v11 = vpop.permute.xlu0 %1203  ;;  %v1390_v26 = vmul.f32 %v3441_v32, %v3496_v5 }
 0x5dd   : > { %v1215_v45 = vmul.f32 %v3448_v35, %v1208_v36  ;;  %v2320_v36 = vpop.eup %2319  ;;  %v1214_v9 = vmul.f32 %v3448_v35, %v1204_v11 }
 0x5de   : > { %2323 = vpow2.f32 %v1143_v34  ;;  %v1392_v34 = vmul.f32 1.442695, %v1390_v26 }
 0x5df   : > { %v3461_v49 = vadd.f32 %v1215_v45, %v1201_v37  ;;  %v3523_v45 = vrot.slane %v3420_v16, %v1486_v48 }
 0x5e1   : > { %v1250_v53 = vmul.f32 %v2312_v51, %v3461_v49  ;;  %v1257_v54 = vpop.permute.xlu1 %1256  ;;  %v2322_v39 = vpop.eup %2321  ;;  %v1509_v51 = vmul.f32 %v3523_v45, %v1502_v42 }
 0x5e2   : > { %v1264_v56 = vmul.f32 %v3466_v52, %v1257_v54  ;;  %v1196_v54 = vmul.f32 1.442695, %v1194_v44 }
 0x5e4   : > { %v3476_v60 = vadd.f32 %v1264_v56, %v1250_v53  ;;  %2325 = vpow2.f32 %v1196_v54  ;;  %v1243_v56 = vmul.f32 %v3407_v10, %v3496_v5 }
 0x5e6   : > { %v1299_v62 = vmul.f32 %v2314_v40, %v3476_v60  ;;  %v1306_v63 = vpop.permute.xlu1 %1305  ;;  %v1245_v48 = vmul.f32 1.442695, %v1243_v56 }
 0x5e7   : > { %v1313_v3 = vmul.f32 %v3480_v61, %v1306_v63  ;;  %v1292_v63 = vmul.f32 %v3415_v14, %v3496_v5 }
 0x5e8   : > { %v2324_v7 = vpop.eup %2323  ;;  %2327 = vpow2.f32 %v1245_v48 }
 0x5e9   : > { %v3487_v6 = vadd.f32 %v1313_v3, %v1299_v62  ;;  %v1147_v58 = vmul.f32 0.0, %v2324_v7 }
 0x5eb   : > { %v1348_v13 = vmul.f32 %v2316_v8, %v3487_v6  ;;  %v1355_v18 = vpop.permute.xlu1 %1354  ;;  %v1294_v8 = vmul.f32 1.442695, %v1292_v63 }
 0x5ec   : > { %v1362_v19 = vmul.f32 %v3492_v41, %v1355_v18 }
 0x5ed   : > { %2329 = vpow2.f32 %v1294_v8 }
 0x5ee   : > { %v3499_v21 = vadd.f32 %v1362_v19, %v1348_v13  ;;  %v2326_v1 = vpop.eup %2325 }
 0x5f0   : > { %v1397_v28 = vmul.f32 %v2318_v25, %v3499_v21  ;;  %v1404_v29 = vpop.permute.xlu1 %1403 }
 0x5f1   : > { %v1411_v30 = vmul.f32 %v3504_v15, %v1404_v29  ;;  %v1224_v29 = vpop.permute.xlu0 %1223 }
 0x5f2   : > { %v2328_v13 = vpop.eup %2327 }
 0x5f3   : > { %v3511_v31 = vadd.f32 %v1411_v30, %v1397_v28 }
 0x5f5   : > { %v1453_v37 = vpop.permute.xlu1 %1452  ;;  %v1446_v4 = vmul.f32 %v2320_v36, %v3511_v31  ;;  %v1170_v36 = vpop.permute.xlu0 %1169 }
 0x5f6   : > { %v1460_v27 = vmul.f32 %v3516_v23, %v1453_v37 }
 0x5f7   : > { %v2330_v35 = vpop.eup %2329 }
 0x5f8   : > { %v3525_v46 = vadd.f32 %v1460_v27, %v1446_v4 }
 0x5fa   : > { %v1152_v33 = vpop.permute.xlu1 %1151  ;;  %v1495_v53 = vmul.f32 %v2322_v39, %v3525_v46 }
 0x5fb   : > { %v1163_v16 = vmul.f32 %v3432_v24, %v1152_v33  ;;  %v1341_v24 = vmul.f32 %v3427_v20, %v3496_v5 }
 0x5fc   : > { %v3529_v55 = vadd.f32 %v1509_v51, %v1495_v53  ;;  %v1318_v53 = vpop.permute.xlu0 %1317 }
 0x5fd   : > { %v1165_v62 = vadd.f32 %v1163_v16, %v1147_v58  ;;  %v1343_v19 = vmul.f32 1.442695, %v1341_v24 }
 0x5ff   : > { %v1253_v57 = vpop.permute.xlu1 %1252  ;;  %v1200_v3 = vmul.f32 %v2326_v1, %v1165_v62  ;;  %2331 = vpow2.f32 %v1343_v19  ;;  %v1177_v27 = vmul.f32 %v1170_v36, %v1165_v62 }
 0x600   : > { %v1263_v14 = vmul.f32 %v3466_v52, %v1253_v57  ;;  %2333 = vpow2.f32 %v1392_v34 }
 0x601   : > { %v1216_v10 = vadd.f32 %v1214_v9, %v1200_v3 }
 0x603   : > { %v1249_v18 = vmul.f32 %v2328_v13, %v1216_v10 }
 0x604   : > { %v1302_v40 = vpop.permute.xlu1 %1301 }
 0x605   : > { %v1265_v25 = vadd.f32 %v1263_v14, %v1249_v18  ;;  %v1312_v20 = vmul.f32 %v3480_v61, %v1302_v40 }
 0x607   : > { %v1298_v30 = vmul.f32 %v2330_v35, %v1265_v25 }
 0x609   : > { %v1351_v2 = vpop.permute.xlu1 %1350  ;;  %v1314_v4 = vadd.f32 %v1312_v20, %v1298_v30  ;;  %v2332_v44 = vpop.eup %2331  ;;  %v1934_v20 = vmul.f32 -1.442695, %v3334_v50 }
 0x60a   : > { %v1361_v32 = vmul.f32 %v3492_v41, %v1351_v2  ;;  %v2334_v61 = vpop.eup %2333  ;;  %v1416_v41 = vpop.permute.xlu0 %1415 }
 0x60b   : > { %v1347_v39 = vmul.f32 %v2332_v44, %v1314_v4  ;;  %v1324_v56 = vmul.f32 %v1318_v53, %v1314_v4 }
 0x60d   : > { %v1363_v33 = vadd.f32 %v1361_v32, %v1347_v39 }
 0x60e   : > { %v1400_v12 = vpop.permute.xlu1 %1399 }
 0x60f   : > { %v1396_v7 = vmul.f32 %v2334_v61, %v1363_v33  ;;  %v1410_v16 = vmul.f32 %v3504_v15, %v1400_v12  ;;  %v1227_v12 = vmul.f32 %v1224_v29, %v3461_v49 }
 0x611   : > { %v1412_v40 = vadd.f32 %v1410_v16, %v1396_v7 }
 0x613   : > { %v3539_v22 = vpop.permute.xlu1 %1448  ;;  %v1422_v2 = vmul.f32 %v1416_v41, %v1412_v40 }
 0x618   : > { %v3544_v28 = vpop.permute.xlu1 %1497 }
 0x61d   : > { %v1175_v37 = vpop.permute.xlu1 %1174 }
 0x61e   : > { %v1178_v42 = vmul.f32 %v1175_v37, %v3443_v43  ;;  %v1439_v43 = vmul.f32 %v3458_v47, %v3496_v5 }
 0x620   : > { %v1179_v52 = vadd.f32 %v1178_v42, %v1177_v27  ;;  %v1441_v63 = vmul.f32 1.442695, %v1439_v43 }
 0x622   : > { %v1273_v51 = vpop.permute.xlu1 %1272  ;;  %v1180_v62 = vrot.slane %v1179_v52, 4  ;;  %2335 = vpow2.f32 %v1441_v63 }
 0x623   : > { %v1276_v30 = vmul.f32 %v1273_v51, %v3476_v60  ;;  %v1469_v51 = vpop.permute.xlu0 %1468 }
 0x624   : > { %v1181_v11 = vadd.f32 %v1180_v62, %v1179_v52 }
 0x626   : > { %v1182_v15 = vrot.slane %v1181_v11, 2 }
 0x627   : > { %v1322_v54 = vpop.permute.xlu1 %1321 }
 0x628   : > { %v1325_v57 = vmul.f32 %v1322_v54, %v3487_v6  ;;  %v1488_v6 = vmul.f32 %v3473_v59, %v3496_v5  ;;  %v1183_v19 = vadd.f32 %v1182_v15, %v1181_v11 }
 0x62a   : > { %v1326_v48 = vadd.f32 %v1325_v57, %v1324_v56  ;;  %v1490_v18 = vmul.f32 1.442695, %v1488_v6  ;;  %v1184_v59 = vrot.slane %v1183_v19, 1 }
 0x62c   : > { %v1371_v58 = vpop.permute.xlu1 %1370  ;;  %v1327_v24 = vrot.slane %v1326_v48, 4  ;;  %2337 = vpow2.f32 %v1490_v18  ;;  %v2336_v37 = vpop.eup %2335  ;;  %v1185_v39 = vadd.f32 %v1184_v59, %v1183_v19 }
 0x62d   : > { %v1445_v52 = vmul.f32 %v2336_v37, %v1412_v40  ;;  %2339 = vpow2.f32 %v1934_v20  ;;  %v1374_v60 = vmul.f32 %v1371_v58, %v3499_v21  ;;  %v1472_v21 = vmul.f32 %v1469_v51, %v3525_v46 }
 0x62e   : > { %v1328_v14 = vadd.f32 %v1327_v24, %v1326_v48  ;;  %v1189_v48 = vsel %vm1186_vm13, %v1185_v39, 0.0 }
 0x630   : > { %v1329_v49 = vrot.slane %v1328_v14, 2 }
 0x631   : > { %v1420_v1 = vpop.permute.xlu1 %1419 }
 0x632   : > { %v1423_v3 = vmul.f32 %v1420_v1, %v3511_v31  ;;  %v1330_v53 = vadd.f32 %v1329_v49, %v1328_v14 }
 0x634   : > { %v1424_v8 = vadd.f32 %v1423_v3, %v1422_v2  ;;  %v1331_v43 = vrot.slane %v1330_v53, 1  ;;  %v1508_v2 = vmul.f32 %v3523_v45, %v3544_v28 }
 0x636   : > { %v1220_v9 = vpop.permute.xlu1 %1219  ;;  %v1425_v31 = vrot.slane %v1424_v8, 4  ;;  %v2338_v63 = vpop.eup %2337 }
 0x637   : > { %v1226_v47 = vmul.f32 %v1220_v9, %v1216_v10  ;;  %v1459_v10 = vmul.f32 %v3516_v23, %v3539_v22  ;;  %v2340_v9 = vpop.eup %2339 }
 0x638   : > { %v1426_v4 = vadd.f32 %v1425_v31, %v1424_v8 }
 0x639   : > { %v1228_v13 = vadd.f32 %v1227_v12, %v1226_v47  ;;  %v1461_v22 = vadd.f32 %v1459_v10, %v1445_v52  ;;  %v1332_v12 = vadd.f32 %v1331_v43, %v1330_v53 }
 0x63a   : > { %v1427_v57 = vrot.slane %v1426_v4, 2 }
 0x63b   : > { %v1229_v26 = vrot.slane %v1228_v13, 4  ;;  %v1269_v35 = vpop.permute.xlu1 %1268  ;;  %v1494_v8 = vmul.f32 %v2338_v63, %v1461_v22 }
 0x63c   : > { %v1275_v34 = vmul.f32 %v1269_v35, %v1265_v25  ;;  %v1428_v41 = vadd.f32 %v1427_v57, %v1426_v4  ;;  %v745_v35 = vadd.f32 1.0, %v2340_v9 }
 0x63d   : > { %v1230_v36 = vadd.f32 %v1229_v26, %v1228_v13  ;;  %v1510_v26 = vadd.f32 %v1508_v2, %v1494_v8 }
 0x63e   : > { %v1277_v5 = vadd.f32 %v1276_v30, %v1275_v34  ;;  %v1429_v47 = vrot.slane %v1428_v41, 1  ;;  %2341 = vrcp.f32 %v745_v35 }
 0x63f   : > { %v1231_v29 = vrot.slane %v1230_v36, 2 }
 0x640   : > { %v1278_v27 = vrot.slane %v1277_v5, 4  ;;  %v1367_v42 = vpop.permute.xlu1 %1366  ;;  %v1430_v20 = vadd.f32 %v1429_v47, %v1428_v41 }
 0x641   : > { %v1232_v25 = vadd.f32 %v1231_v29, %v1230_v36  ;;  %v1373_v44 = vmul.f32 %v1367_v42, %v1363_v33 }
 0x642   : > { %v1279_v32 = vadd.f32 %v1278_v27, %v1277_v5 }
 0x643   : > { %v1233_v54 = vrot.slane %v1232_v25, 1  ;;  %v1375_v56 = vadd.f32 %v1374_v60, %v1373_v44 }
 0x644   : > { %v1280_v23 = vrot.slane %v1279_v32, 2 }
 0x645   : > { %v1234_v61 = vadd.f32 %v1233_v54, %v1232_v25  ;;  %v1376_v7 = vrot.slane %v1375_v56, 4  ;;  %v1465_v16 = vpop.permute.xlu1 %1464 }
 0x646   : > { %v1281_v33 = vadd.f32 %v1280_v23, %v1279_v32  ;;  %v1471_v58 = vmul.f32 %v1465_v16, %v1461_v22 }
 0x647   : > { %v1238_v40 = vsel %vm1235_vm14, %v1234_v61, %v1189_v48  ;;  %v1377_v62 = vadd.f32 %v1376_v7, %v1375_v56 }
 0x648   : > { %v1282_v1 = vrot.slane %v1281_v33, 1  ;;  %v1473_v11 = vadd.f32 %v1472_v21, %v1471_v58  ;;  %v2342_v25 = vpop.eup %2341 }
 0x649   : > { %v1378_v3 = vrot.slane %v1377_v62, 2  ;;  %v748_v51 = vmul.f32 %v2342_v25, %v3334_v50 }
 0x64a   : > { %v1283_v6 = vadd.f32 %v1282_v1, %v1281_v33  ;;  %v1474_v46 = vrot.slane %v1473_v11, 4  ;;  %v1514_v15 = vpop.permute.xlu1 %1513 }
 0x64b   : > { %v1379_v24 = vadd.f32 %v1378_v3, %v1377_v62  ;;  %v1520_v31 = vmul.f32 %v1514_v15, %v1510_v26 }
 0x64c   : > { %v1287_v13 = vsel %vm1284_vm15, %v1283_v6, %v1238_v40  ;;  %v1475_v18 = vadd.f32 %v1474_v46, %v1473_v11 }
 0x64d   : > { %v1336_v19 = vsel %vm1333_vm1, %v1332_v12, %v1287_v13  ;;  %v1380_v14 = vrot.slane %v1379_v24, 1 }
 0x64e   : > { %v1476_v45 = vrot.slane %v1475_v18, 2  ;;  %v1518_v28 = vpop.permute.xlu1 %1517 }
 0x64f   : > { %v1381_v30 = vadd.f32 %v1380_v14, %v1379_v24  ;;  %v1521_v34 = vmul.f32 %v1518_v28, %v3529_v55  ;;  %v1959_v55 = vld [vmem:[#allocation24] ss:$0 sm:$0xff] }
 0x650   : > { %v1477_v36 = vadd.f32 %v1476_v45, %v1475_v18  ;;  %v1543_v39 = vmul.f32 %v1959_v55, %v3336_v17 }
 0x651   : > { %v1385_v59 = vsel %vm1382_vm2, %v1381_v30, %v1336_v19  ;;  %v1522_v5 = vadd.f32 %v1521_v34, %v1520_v31 }
 0x652   : > { %v1434_v37 = vsel %vm1431_vm3, %v1430_v20, %v1385_v59  ;;  %v1478_v49 = vrot.slane %v1477_v36, 1 }
 0x653   : > { %v1523_v29 = vrot.slane %v1522_v5, 4 }
 0x654   : > { %v1479_v10 = vadd.f32 %v1478_v49, %v1477_v36 }
 0x655   : > { %v1524_v4 = vadd.f32 %v1523_v29, %v1522_v5 }
 0x656   : > { %v1483_v27 = vsel %vm1480_vm4, %v1479_v10, %v1434_v37 }
 0x657   : > { %v1525_v42 = vrot.slane %v1524_v4, 2 }
 0x659   : > { %v1526_v52 = vadd.f32 %v1525_v42, %v1524_v4 }
 0x65b   : > { %v1527_v60 = vrot.slane %v1526_v52, 1 }
 0x65d   : > { %v1528_v44 = vadd.f32 %v1527_v60, %v1526_v52 }
 0x65f   : > { %v1532_v32 = vsel %vm1529_vm5, %v1528_v44, %v1483_v27 }
 0x660   : > { %v1544_v53 = vadd.f32 %v1543_v39, %v1532_v32 }
 0x662   : > { %v1546_v54 = vmul.f32 %v1544_v53, %v748_v51 }
 0x664   : > { %v1547_v56 = vpack.c.bf16 %v1546_v54, %v1546_v54 }
 0x666   : > { %2056 = vmatmul.mubr.bf16.vlgmr.msra.gmra.mrb[4].mxu1 %v1547_v56 }
 0x667   : > { %2694 = shalt.err (!%p2691_p9)
}
 0x668   : > { %s2695_s1 = scalar_lea.hbm %s3585_s23, 128  ;;  %s2699_s29 = scalar_lea.hbm %s3720_s18, 256 }
 0x669   : > { %p2696_p7 = scmp.ne.s32.totalorder %s3585_s23, %s2695_s1  ;;  %p2700_p1 = scmp.lt.u32.totalorder %s3585_s23, %s3720_s18 }
 0x66a   : > { %p2701_p13 = scmp.lt.u32.totalorder %s2699_s29, %s2695_s1  ;;  %p2703_p2 = scmp.lt.u32.totalorder %s2695_s1, %s3585_s23 }
 0x66b   : > { %p2697_p10 = pnand %p2696_p7, %p3721_p3 }
 0x66c   : > { %p2702_p0 = por %p2701_p13, %p2700_p1 }
 0x66d   : > { %p2698_p4 = pneg %p2697_p10 }
 0x66e   : > { %p2704_p6 = por %p2703_p2, %p2702_p0 }
 0x670   : > { %p2705_p11 = pnand %p2704_p6, %p2698_p4 }
 0x672   : > { %2708 = shalt.err (!%p2705_p11)
}
 0x673   : > { %2106 = dma.vmem_to_hbm [thread:$0]  (%p3721_p3), %s1686_s5, 128, %s3585_s23, %s1659_s30  }
 0x674   : > { %s607_s0 = scalar_lea.vmem [#allocation27], %s3259_s20  ;;  %s3722_s3 = sshll.u32 %s2924_s14, 7 }
 0x675   : > { %s1672_s21 = sshll.u32 %s607_s0, 4  ;;  %s3723_s17 = sld [smem:[#allocation44_spill]]  ;;  %s3613_s21 = int_to_ptr.vmem [resolvable:$true] %s1672_s21 }
 0x676   : > { %s1654_s1 = scalar_lea.sflag [#allocation9], %s3256_s12  ;;  %s2709_s23 = scalar_lea.vmem %s3613_s21, 128 }
 0x677   : > { %p2710_p12 = scmp.ne.s32.totalorder %s3613_s21, %s2709_s23  ;;  %s2832_s14 = smov [#allocation27]  }
 0x678   : > { %s2713_s20 = sshll.u32 %s2832_s14, 4  ;;  %s2714_s20 = int_to_ptr.vmem [resolvable:$false] %s2713_s20 }
 0x679   : > { %p2711_p8 = pnand %p2710_p12, %p3721_p3  ;;  %s2715_s5 = scalar_lea.vmem %s2714_s20, 256 }
 0x67a   : > { %p2716_p9 = scmp.lt.s32.totalorder %s3613_s21, %s2714_s20  ;;  %p2717_p7 = scmp.lt.s32.totalorder %s2715_s5, %s2709_s23 }
 0x67b   : > { %s3611_s29 = scalar_lea.hbm %s3723_s17, %s3722_s3  ;;  %p2712_p5 = pneg %p2711_p8 }
 0x67c   : > { %p2718_p10 = por %p2717_p7, %p2716_p9 }
 0x67e   : > { %p2719_p4 = pnand %p2718_p10, %p2712_p5 }
 0x739   : > { %v1646_v0 = vpop.f32.mrb[4].mxu1 }
 0x73a   : > { %1652 = vst.msk [vmem:[%s607_s0] sm:$0xff] %vm617_vm0, %v1646_v0  ;;  %v2057_v38 = vpop.f32.mrb[5].mxu1 }
 0x73b   : > { %v1649_v50 = vpop.f32.mrb[6].mxu1 }
 0x73c   : > { %2722 = shalt.err (!%p2719_p4)
}
 0x73d   : > { %s2723_s12 = scalar_lea.hbm %s3611_s29, 128  ;;  %s2727_s3 = scalar_lea.hbm %s3723_s17, 256 }
 0x73e   : > { %p2724_p1 = scmp.ne.s32.totalorder %s3611_s29, %s2723_s12  ;;  %p2728_p2 = scmp.lt.u32.totalorder %s3611_s29, %s3723_s17 }
 0x73f   : > { %p2729_p6 = scmp.lt.u32.totalorder %s2727_s3, %s2723_s12  ;;  %p2731_p12 = scmp.lt.u32.totalorder %s2723_s12, %s3611_s29 }
 0x740   : > { %p2725_p13 = pnand %p2724_p1, %p3721_p3 }
 0x741   : > { %p2730_p11 = por %p2729_p6, %p2728_p2 }
 0x742   : > { %p2726_p0 = pneg %p2725_p13 }
 0x743   : > { %p2732_p8 = por %p2731_p12, %p2730_p11 }
 0x745   : > { %p2733_p5 = pnand %p2732_p8, %p2726_p0 }
 0x747   : > { %2736 = shalt.err (!%p2733_p5)
}
 0x748   : > { %2105 = dma.vmem_to_hbm [thread:$0]  (%p3721_p3), %s3613_s21, 128, %s3611_s29, %s1654_s1   ;;  %v2058_v17 = vpop.f32.mrb[7].mxu1 }
 0x749 PF: > { %s1697_s23 = sand.u32 1, %s2791_s25   ;;  %p3724_p9 = scmp.ne.s32.totalorder %s3703_s13, 0 }
 0x74a   : > { %p3725_p7 = scmp.ge.s32.totalorder %s2803_s28, 2  ;;  %s1698_s14 = scalar_lea.sflag [#allocation9], %s1697_s23 }
 0x74c   : > { %p2148_p10 = pnand %p3725_p7, %p3724_p9 }
 0x74e   : > { %2782 = dma.done.wait (!%p2148_p10), %s1698_s14, 128  }
 0x74f   : > { %2784 = vsyncadd (!%p2148_p10), %s1698_s14, 4294967168  ;;  %s1707_s20 = scalar_lea.sflag [#allocation29], %s1697_s23 }
 0x750   : > { %2786 = dma.done.wait (!%p2148_p10), %s1707_s20, 128  }
 0x751   : > { %2788 = vsyncadd (!%p2148_p10), %s1707_s20, 4294967168  ;;  %p36_p3 = scmp.ge.s32.totalorder %s3186_s16, 4   ;;  %s3726_s25 = smov %s2795_s26 }
 0x752   : > { %s3727_s26 = smov %s2799_s27  ;;  %s3728_s27 = smov %s3198_s24 }
 0x753   : > { %s3729_s28 = smov %s3186_s16  ;;  %38 = sbr.rel (!%p36_p3) target bundleno = 20 (0x14), region = 174 }
 0x75a   :  { %1712 = vsyncpa [#allocation8], 1 }
 0x75b   :  { %1714 = vsyncpa [#allocation8 + $0x1], 1 }
 0x75c   :  { %1715 = vsyncpa [#allocation11], 1 }
 0x75d   :  { %1716 = vsyncpa [#allocation14], 1 }
 0x75e   :  { %1717 = vsyncpa [#allocation17], 1 }
 0x75f   :  { %1718 = vsyncpa [#allocation20], 1 }
 0x760   :  { %1719 = vsyncpa [#allocation23], 1 }
 0x761   :  { %1720 = vsyncpa [#allocation26], 1 }
 0x762   :  { %1721 = vsyncpa [#allocation9], 1 }
 0x763   :  { %1723 = vsyncpa [#allocation9 + $0x1], 1 }
 0x764   :  { %1724 = vsyncpa [#allocation29], 1 }
 0x765   :  { %1726 = vsyncpa [#allocation29 + $0x1], 1 }

</bundles_post_ra>
